<compile_context>
chip_gen: v5e
topology: v5e:2x2
jax: 0.10.0
libtpu: 0.0.40
codegen_flags: <defaults>
</compile_context>

<pallas_src>
import jax
import jax.numpy as jnp
from jax import lax
from jax.experimental import pallas as pl
from jax.experimental.pallas import tpu as pltpu  # noqa: F401  (defaults used deliberately)

# ---------------- configuration (small, consistent with the module) ----------
B = 2          # batch
NV = 8         # number of region (vision) features
NT = 8         # question token length
DV = 64        # raw region-feature dim
D = 32         # D_MODEL
H = 4          # attention heads
HD = D // H    # head dim (power of two -> shift)
FF = 64        # encoder FFN hidden dim
VOCAB = 50     # question vocab size
A = 16         # vocab.total_answers
N = NV + NT    # fused sequence length (power of two -> shift)
BN = B * N     # flattened (batch * sequence) rows
LANE = 128     # TPU lane width (slab / output padding)
EPS = 1e-5
NEG = -1e9

# row offsets inside the single packed weight slab (all multiples of 8, all
# weights start at lane 0 -> every in-kernel slice is relayout-free)
R_QKV = 0            # (D, 3D)   fused Wq|Wk|Wv
R_WO = D             # (D, D)
R_AR1 = 2 * D        # (D, D)    attr_reduce fc1
R_PW = 3 * D         # (D, D)    proj
R_W1 = 4 * D         # (D, FF)   encoder FFN fc1
R_CW = 5 * D         # (D, 128)  classify (zero-padded beyond A)
R_W2 = 6 * D         # (FF, D)   encoder FFN fc2
R_BIAS = 8 * D       # (16, 128) bias slab
R_TOTAL = R_BIAS + 16


def _ln(x, g, b):
    mu = jnp.mean(x, axis=-1, keepdims=True)
    var = jnp.mean((x - mu) ** 2, axis=-1, keepdims=True)
    return (x - mu) * lax.rsqrt(var + EPS) * g + b


# ----------------------------- Pallas kernel ---------------------------------
def vqa_kernel(x_ref, kadd_ref, w_ref, out_ref):
    x = x_ref[...]                       # (BN, D)  both batch elements, flattened
    kadd = kadd_ref[...]                 # (1, BN)  additive key-padding row

    # ---- static slices of the single packed weight slab ---------------------
    wqkv = w_ref[R_QKV:R_QKV + D, 0:3 * D]
    wo = w_ref[R_WO:R_WO + D, 0:D]
    arw1 = w_ref[R_AR1:R_AR1 + D, 0:D]
    pw = w_ref[R_PW:R_PW + D, 0:D]
    w1 = w_ref[R_W1:R_W1 + D, 0:FF]
    cw = w_ref[R_CW:R_CW + D, :]         # (D, 128), zero cols beyond A
    w2 = w_ref[R_W2:R_W2 + FF, 0:D]
    bv = w_ref[R_BIAS:R_BIAS + 16, :]    # (16, 128) bias slab

    bqkv = bv[0:1, 0:3 * D]
    bo = bv[1:2, 0:D]
    ln1g = bv[2:3, 0:D]
    ln1b = bv[3:4, 0:D]
    b1 = bv[4:5, 0:FF]
    b2 = bv[5:6, 0:D]
    ln2g = bv[6:7, 0:D]
    ln2b = bv[7:8, 0:D]
    arb1 = bv[8:9, 0:D]
    arw2 = bv[9:10, 0:D]                 # attr_reduce fc2 weight as a row vector
    arb2 = bv[9:10, D:D + 1]             # attr_reduce fc2 bias (scalar)
    pb = bv[10:11, 0:D]
    lng = bv[11:12, 0:D]
    lnb = bv[12:13, 0:D]
    cb = bv[13:14, :]                    # (1, 128): classify bias, pad lanes = -1e9

    # ---- additive attention mask built in-kernel -----------------------------
    # block-diagonal over batches (cross-batch = -1e9 -> exp underflows to 0)
    # plus the per-key text-padding row.  N == 16 is a power of two -> shifts.
    row_i = lax.broadcasted_iota(jnp.int32, (BN, BN), 0)
    col_i = lax.broadcasted_iota(jnp.int32, (BN, BN), 1)
    same_batch = lax.shift_right_logical(row_i, 4) == lax.shift_right_logical(col_i, 4)
    amask = jnp.where(same_batch, kadd, NEG)                       # (BN, BN)

    # ---- fused QKV projection (one MXU push) ---------------------------------
    qkv = jnp.dot(x, wqkv, preferred_element_type=jnp.float32) + bqkv   # (BN, 3D)
    scale = 1.0 / (HD ** 0.5)
    q = qkv[:, 0:D] * scale
    k = qkv[:, D:2 * D]
    v = qkv[:, 2 * D:3 * D]

    # per-head lane masks (HD == 8 is a power of two -> shift)
    lane_head = lax.shift_right_logical(
        lax.broadcasted_iota(jnp.int32, (BN, D), 1), 3)

    # ---- multi-head self-attention, lane-dense -------------------------------
    # Every matmul is M=BN, K=D, N∈{BN,D}; head selection is a VPU lane mask,
    # so there are no narrow (8-lane) slices / relayouts inside the loop.
    o_cat = jnp.zeros((BN, D), jnp.float32)
    for h in range(H):                   # H = 4, static
        qh = jnp.where(lane_head == h, q, 0.0)                     # zero other heads
        s = lax.dot_general(qh, k, (((1,), (1,)), ((), ())),
                            preferred_element_type=jnp.float32) + amask
        s = s - jnp.max(s, axis=-1, keepdims=True)
        p = jnp.exp(s)
        p = p * pl.reciprocal(jnp.sum(p, axis=-1, keepdims=True), approx=True)
        ov = jnp.dot(p, v, preferred_element_type=jnp.float32)     # (BN, D)
        o_cat = o_cat + jnp.where(lane_head == h, ov, 0.0)         # == head concat
    attn = jnp.dot(o_cat, wo, preferred_element_type=jnp.float32) + bo

    # ---- post-LN encoder: residual + LN, FFN, residual + LN ------------------
    x1 = _ln(x + attn, ln1g, ln1b)
    ff = jnp.maximum(jnp.dot(x1, w1, preferred_element_type=jnp.float32) + b1, 0.0)
    ff = jnp.dot(ff, w2, preferred_element_type=jnp.float32) + b2
    x2 = _ln(x1 + ff, ln2g, ln2b)                                  # (BN, D)

    # ---- attr_reduce MLP; (D -> 1) layer as VPU multiply + lane reduce -------
    hmid = jnp.maximum(jnp.dot(x2, arw1, preferred_element_type=jnp.float32) + arb1, 0.0)
    score = jnp.sum(hmid * arw2, axis=-1, keepdims=True) + arb2    # (BN, 1)

    # ---- per-batch softmax over the sequence + attention pooling -------------
    pooled_rows = []
    for b in range(B):                   # B = 2, static; 8-aligned sublane slices
        x2b = x2[b * N:(b + 1) * N, :]                  # (N, D)
        scb = score[b * N:(b + 1) * N, :]               # (N, 1)
        scb = scb - jnp.max(scb, axis=0, keepdims=True)
        eb = jnp.exp(scb)
        wb = eb * pl.reciprocal(jnp.sum(eb, axis=0, keepdims=True), approx=True)
        pooled_rows.append(jnp.sum(x2b * wb, axis=0, keepdims=True))   # (1, D)
    pooled = jnp.concatenate(pooled_rows, axis=0)                      # (B, D)

    # ---- proj -> LayerNorm -> classify -> log_softmax (lane-dense output) ----
    o = jnp.dot(pooled, pw, preferred_element_type=jnp.float32) + pb
    o = _ln(o, lng, lnb)
    logits = jnp.dot(o, cw, preferred_element_type=jnp.float32) + cb   # (B, 128)
    logits = logits - jnp.max(logits, axis=-1, keepdims=True)
    lse = jnp.log(jnp.sum(jnp.exp(logits), axis=-1, keepdims=True))
    out_ref[...] = logits - lse


# -------------------------- one-time weight packing ---------------------------
def pack_params(params):
    """Runs ONCE (outside the per-call jitted path): packs the 26 weight/bias
    tensors into a single lane-dense (272, 128) f32 slab -> one input DMA."""

    def row(vec, fill=0.0):
        r = jnp.full((1, LANE), fill, jnp.float32)
        v = vec.astype(jnp.float32).reshape(1, -1)
        return r.at[:, :v.shape[1]].set(v)

    bias_rows = jnp.concatenate([
        row(jnp.concatenate([params["bq"], params["bk"], params["bv"]], axis=1)),  # 0
        row(params["bo"]),                                                         # 1
        row(params["ln1g"]), row(params["ln1b"]),                                  # 2,3
        row(params["b1"]), row(params["b2"]),                                      # 4,5
        row(params["ln2g"]), row(params["ln2b"]),                                  # 6,7
        row(params["arb1"]),                                                       # 8
        row(jnp.concatenate([params["arw2"].T, params["arb2"]], axis=1)),          # 9
        row(params["pb"]),                                                         # 10
        row(params["lng"]), row(params["lnb"]),                                    # 11,12
        row(params["cb"], fill=NEG),                                               # 13
        jnp.zeros((2, LANE), jnp.float32),                                         # 14,15
    ], axis=0)                                                                     # (16,128)

    w = jnp.zeros((R_TOTAL, LANE), jnp.float32)
    w = w.at[R_QKV:R_QKV + D, :3 * D].set(
        jnp.concatenate([params["wq"], params["wk"], params["wv"]], axis=1).astype(jnp.float32))
    w = w.at[R_WO:R_WO + D, :D].set(params["wo"].astype(jnp.float32))
    w = w.at[R_AR1:R_AR1 + D, :D].set(params["arw1"].astype(jnp.float32))
    w = w.at[R_PW:R_PW + D, :D].set(params["pw"].astype(jnp.float32))
    w = w.at[R_W1:R_W1 + D, :FF].set(params["w1"].astype(jnp.float32))
    w = w.at[R_CW:R_CW + D, :A].set(params["cw"].astype(jnp.float32))
    w = w.at[R_W2:R_W2 + FF, :D].set(params["w2"].astype(jnp.float32))
    w = w.at[R_BIAS:R_BIAS + 16, :].set(bias_rows)

    return {"vis_w": params["vis_w"], "vis_b": params["vis_b"],
            "tok_emb": params["tok_emb"], "w_slab": w}


# ------------------------------- wrapper --------------------------------------
@jax.jit
def vanilla_transformer_forward(region_features, question_tokens, packed):
    # glue (unavoidable gather / tiny projection): vision linear embedding,
    # token-embedding lookup, concat.  TODO(synk): the embedding gather has no
    # clean whole-array Pallas equivalent at this size; kept as XLA ops.
    vis = jnp.einsum("bnf,fd->bnd", region_features, packed["vis_w"]) + packed["vis_b"]
    txt = jnp.take(packed["tok_emb"], question_tokens, axis=0)            # (B, NT, D)
    x_flat = jnp.concatenate([vis, txt], axis=1).astype(jnp.float32).reshape(BN, D)

    # per-key additive padding row (vision never padded; text pad token == 0)
    key_add = jnp.concatenate(
        [jnp.zeros((B, NV), jnp.float32),
         jnp.where(question_tokens == 0, NEG, 0.0).astype(jnp.float32)],
        axis=-1).reshape(1, BN)

    # Single no-grid invocation: whole-array VMEM blocks, 3 input DMAs + 1
    # output DMA, no pipeline machinery.  (If batch is scaled up, add a grid
    # over batch groups with dimension_semantics=("parallel",) for v7x's two
    # TensorCores and re-derive tiling against its 64 MiB VMEM.)
    out = pl.pallas_call(
        vqa_kernel,
        out_shape=jax.ShapeDtypeStruct((B, LANE), jnp.float32),
    )(x_flat, key_add, packed["w_slab"])
    return out[:, :A]                                                      # (B, A)


# --------------------------- pure-JAX reference -------------------------------
def _reference_single(x, mask, p):
    q = x @ p["wq"] + p["bq"]
    k = x @ p["wk"] + p["bk"]
    v = x @ p["wv"] + p["bv"]
    heads = []
    for h in range(H):
        qh, kh, vh = (t[:, h * HD:(h + 1) * HD] for t in (q, k, v))
        s = qh @ kh.T / (HD ** 0.5) + mask
        heads.append(jax.nn.softmax(s, axis=-1) @ vh)
    attn = jnp.concatenate(heads, -1) @ p["wo"] + p["bo"]
    x1 = _ln(x + attn, p["ln1g"], p["ln1b"])
    ff = jnp.maximum(x1 @ p["w1"] + p["b1"], 0.0) @ p["w2"] + p["b2"]
    x2 = _ln(x1 + ff, p["ln2g"], p["ln2b"])
    att = jnp.maximum(x2 @ p["arw1"] + p["arb1"], 0.0) @ p["arw2"] + p["arb2"]
    att = jax.nn.softmax(att, axis=0)
    pooled = jnp.sum(x2 * att, axis=0, keepdims=True)
    o = _ln(pooled @ p["pw"] + p["pb"], p["lng"], p["lnb"])
    return jax.nn.log_softmax(o @ p["cw"] + p["cb"], axis=-1)[0]


def reference_forward(region_features, question_tokens, params):
    vis = jnp.einsum("bnf,fd->bnd", region_features, params["vis_w"]) + params["vis_b"]
    txt = jnp.take(params["tok_emb"], question_tokens, axis=0)
    fused = jnp.concatenate([vis, txt], axis=1)
    pad = jnp.concatenate([jnp.zeros((B, NV), bool), question_tokens == 0], -1)
    mask_add = jnp.where(pad, NEG, 0.0).astype(jnp.float32)[:, None, :]
    return jax.vmap(lambda x, m: _reference_single(x, m, params))(fused, mask_add)


# -------------------------------- params --------------------------------------
def init_params(key):
    names_shapes = {
        "vis_w": (DV, D), "vis_b": (1, D), "tok_emb": (VOCAB, D),
        "wq": (D, D), "bq": (1, D), "wk": (D, D), "bk": (1, D),
        "wv": (D, D), "bv": (1, D), "wo": (D, D), "bo": (1, D),
        "ln1g": (1, D), "ln1b": (1, D),
        "w1": (D, FF), "b1": (1, FF), "w2": (FF, D), "b2": (1, D),
        "ln2g": (1, D), "ln2b": (1, D),
        "arw1": (D, D), "arb1": (1, D), "arw2": (D, 1), "arb2": (1, 1),
        "pw": (D, D), "pb": (1, D), "lng": (1, D), "lnb": (1, D),
        "cw": (D, A), "cb": (1, A),
    }
    params = {}
    keys = jax.random.split(key, len(names_shapes))
    for (name, shape), k in zip(names_shapes.items(), keys):
        if name in ("ln1g", "ln2g", "lng"):
            params[name] = jnp.ones(shape, jnp.float32)
        elif name in ("ln1b", "ln2b", "lnb"):
            params[name] = jnp.zeros(shape, jnp.float32)
        else:
            params[name] = (0.05 * jax.random.normal(k, shape)).astype(jnp.float32)
    return params


# ---------------------------------- main ---------------------------------------
if __name__ == "__main__":
    key = jax.random.PRNGKey(0)
    k_p, k_r, k_t = jax.random.split(key, 3)

    params = init_params(k_p)
    packed = pack_params(params)          # one-time packing, outside the hot path

    region_features = jax.random.normal(k_r, (B, NV, DV), jnp.float32)
    question_tokens = jax.random.randint(k_t, (B, NT), 1, VOCAB, jnp.int32)
    # introduce some padding in the second question (token id 0 == <pad>)
    question_tokens = question_tokens.at[1, -3:].set(0)

    out = vanilla_transformer_forward(region_features, question_tokens, packed)
    out = jax.block_until_ready(out)

    ref = reference_forward(region_features, question_tokens, params)
    assert out.shape == (B, A)
    # tolerance accounts for the EUP approx-reciprocal softmax denominators
    # (relative error ~1e-4); real bugs show up as O(0.1) discrepancies.
    assert jnp.allclose(out, ref, atol=5e-3, rtol=5e-3), "mismatch vs JAX reference"

    print("KERNEL_OK")
</pallas_src>

<mosaic_0001>
module attributes {stable_mosaic.version = 11 : i64} {
  func.func @vqa_kernel(%arg0: memref<32x32xf32, #tpu.memory_space<vmem>>, %arg1: memref<1x32xf32, #tpu.memory_space<vmem>>, %arg2: memref<272x128xf32, #tpu.memory_space<vmem>>, %arg3: memref<2x128xf32, #tpu.memory_space<vmem>>) attributes {dimension_semantics = [], scalar_prefetch = 0 : i64, scratch_operands = 0 : i64, tpu.core_type = #tpu.core_type<tc>} {
    %c0 = arith.constant 0 : index
    %c0_0 = arith.constant 0 : index
    %0 = vector.load %arg0[%c0, %c0_0] : memref<32x32xf32, #tpu.memory_space<vmem>>, vector<32x32xf32>
    %c0_1 = arith.constant 0 : index
    %c0_2 = arith.constant 0 : index
    %1 = vector.load %arg1[%c0_1, %c0_2] : memref<1x32xf32, #tpu.memory_space<vmem>>, vector<1x32xf32>
    %c0_3 = arith.constant 0 : index
    %c0_4 = arith.constant 0 : index
    %2 = vector.load %arg2[%c0_3, %c0_4] : memref<272x128xf32, #tpu.memory_space<vmem>>, vector<32x96xf32>
    %c32 = arith.constant 32 : index
    %c0_5 = arith.constant 0 : index
    %3 = vector.load %arg2[%c32, %c0_5] : memref<272x128xf32, #tpu.memory_space<vmem>>, vector<32x32xf32>
    %c64 = arith.constant 64 : index
    %c0_6 = arith.constant 0 : index
    %4 = vector.load %arg2[%c64, %c0_6] : memref<272x128xf32, #tpu.memory_space<vmem>>, vector<32x32xf32>
    %c96 = arith.constant 96 : index
    %c0_7 = arith.constant 0 : index
    %5 = vector.load %arg2[%c96, %c0_7] : memref<272x128xf32, #tpu.memory_space<vmem>>, vector<32x32xf32>
    %c128 = arith.constant 128 : index
    %c0_8 = arith.constant 0 : index
    %6 = vector.load %arg2[%c128, %c0_8] : memref<272x128xf32, #tpu.memory_space<vmem>>, vector<32x64xf32>
    %c160 = arith.constant 160 : index
    %c0_9 = arith.constant 0 : index
    %7 = vector.load %arg2[%c160, %c0_9] : memref<272x128xf32, #tpu.memory_space<vmem>>, vector<32x128xf32>
    %c192 = arith.constant 192 : index
    %c0_10 = arith.constant 0 : index
    %8 = vector.load %arg2[%c192, %c0_10] : memref<272x128xf32, #tpu.memory_space<vmem>>, vector<64x32xf32>
    %c256 = arith.constant 256 : index
    %c0_11 = arith.constant 0 : index
    %9 = vector.load %arg2[%c256, %c0_11] : memref<272x128xf32, #tpu.memory_space<vmem>>, vector<16x128xf32>
    %10 = vector.extract_strided_slice %9 {offsets = [0, 0], sizes = [1, 96], strides = [1, 1]} : vector<16x128xf32> to vector<1x96xf32>
    %11 = vector.extract_strided_slice %9 {offsets = [1, 0], sizes = [1, 32], strides = [1, 1]} : vector<16x128xf32> to vector<1x32xf32>
    %12 = vector.extract_strided_slice %9 {offsets = [2, 0], sizes = [1, 32], strides = [1, 1]} : vector<16x128xf32> to vector<1x32xf32>
    %13 = vector.extract_strided_slice %9 {offsets = [3, 0], sizes = [1, 32], strides = [1, 1]} : vector<16x128xf32> to vector<1x32xf32>
    %14 = vector.extract_strided_slice %9 {offsets = [4, 0], sizes = [1, 64], strides = [1, 1]} : vector<16x128xf32> to vector<1x64xf32>
    %15 = vector.extract_strided_slice %9 {offsets = [5, 0], sizes = [1, 32], strides = [1, 1]} : vector<16x128xf32> to vector<1x32xf32>
    %16 = vector.extract_strided_slice %9 {offsets = [6, 0], sizes = [1, 32], strides = [1, 1]} : vector<16x128xf32> to vector<1x32xf32>
    %17 = vector.extract_strided_slice %9 {offsets = [7, 0], sizes = [1, 32], strides = [1, 1]} : vector<16x128xf32> to vector<1x32xf32>
    %18 = vector.extract_strided_slice %9 {offsets = [8, 0], sizes = [1, 32], strides = [1, 1]} : vector<16x128xf32> to vector<1x32xf32>
    %19 = vector.extract_strided_slice %9 {offsets = [9, 0], sizes = [1, 32], strides = [1, 1]} : vector<16x128xf32> to vector<1x32xf32>
    %20 = vector.extract_strided_slice %9 {offsets = [9, 32], sizes = [1, 1], strides = [1, 1]} : vector<16x128xf32> to vector<1x1xf32>
    %21 = vector.extract_strided_slice %9 {offsets = [10, 0], sizes = [1, 32], strides = [1, 1]} : vector<16x128xf32> to vector<1x32xf32>
    %22 = vector.extract_strided_slice %9 {offsets = [11, 0], sizes = [1, 32], strides = [1, 1]} : vector<16x128xf32> to vector<1x32xf32>
    %23 = vector.extract_strided_slice %9 {offsets = [12, 0], sizes = [1, 32], strides = [1, 1]} : vector<16x128xf32> to vector<1x32xf32>
    %24 = vector.extract_strided_slice %9 {offsets = [13, 0], sizes = [1, 128], strides = [1, 1]} : vector<16x128xf32> to vector<1x128xf32>
    %25 = tpu.iota {dimensions = array<i32: 0>} : vector<32x32xi32>
    %26 = tpu.iota {dimensions = array<i32: 1>} : vector<32x32xi32>
    %c4_i32 = arith.constant 4 : i32
    %27 = vector.broadcast %c4_i32 : i32 to vector<32x32xi32>
    %28 = arith.shrui %25, %27 : vector<32x32xi32>
    %c4_i32_12 = arith.constant 4 : i32
    %29 = vector.broadcast %c4_i32_12 : i32 to vector<32x32xi32>
    %30 = arith.shrui %26, %29 : vector<32x32xi32>
    %31 = arith.cmpi eq, %28, %30 : vector<32x32xi32>
    %cst = arith.constant -1.000000e+09 : f32
    %32 = vector.shape_cast %1 : vector<1x32xf32> to vector<1x32xf32>
    %33 = vector.broadcast %32 : vector<1x32xf32> to vector<32x32xf32>
    %34 = vector.broadcast %cst : f32 to vector<32x32xf32>
    %35 = arith.select %31, %33, %34 : vector<32x32xi1>, vector<32x32xf32>
    %cst_13 = arith.constant dense<0.000000e+00> : vector<32x96xf32>
    %36 = tpu.matmul %0, %2, %cst_13 {dimension_numbers = #tpu.dot_dimension_numbers<[1], [0], [0], [1], [0, 0, 1, 1], [], []>} : vector<32x32xf32>, vector<32x96xf32>, vector<32x96xf32> -> vector<32x96xf32>
    %37 = vector.broadcast %10 : vector<1x96xf32> to vector<32x96xf32>
    %38 = arith.addf %36, %37 : vector<32x96xf32>
    %39 = vector.extract_strided_slice %38 {offsets = [0, 0], sizes = [32, 32], strides = [1, 1]} : vector<32x96xf32> to vector<32x32xf32>
    %cst_14 = arith.constant 0.353553385 : f32
    %40 = vector.broadcast %cst_14 : f32 to vector<32x32xf32>
    %41 = arith.mulf %39, %40 : vector<32x32xf32>
    %42 = vector.extract_strided_slice %38 {offsets = [0, 32], sizes = [32, 32], strides = [1, 1]} : vector<32x96xf32> to vector<32x32xf32>
    %43 = vector.extract_strided_slice %38 {offsets = [0, 64], sizes = [32, 32], strides = [1, 1]} : vector<32x96xf32> to vector<32x32xf32>
    %44 = tpu.iota {dimensions = array<i32: 1>} : vector<32x32xi32>
    %c3_i32 = arith.constant 3 : i32
    %45 = vector.broadcast %c3_i32 : i32 to vector<32x32xi32>
    %46 = arith.shrui %44, %45 : vector<32x32xi32>
    %cst_15 = arith.constant 0.000000e+00 : f32
    %47 = vector.broadcast %cst_15 : f32 to vector<32x32xf32>
    %c0_i32 = arith.constant 0 : i32
    %48 = vector.broadcast %c0_i32 : i32 to vector<32x32xi32>
    %49 = arith.cmpi eq, %46, %48 : vector<32x32xi32>
    %cst_16 = arith.constant 0.000000e+00 : f32
    %50 = vector.broadcast %cst_16 : f32 to vector<32x32xf32>
    %51 = arith.select %49, %41, %50 : vector<32x32xi1>, vector<32x32xf32>
    %cst_17 = arith.constant dense<0.000000e+00> : vector<32x32xf32>
    %52 = tpu.matmul %51, %42, %cst_17 {dimension_numbers = #tpu.dot_dimension_numbers<[1], [1], [0], [0], [0, 0, 1, 0], [], []>} : vector<32x32xf32>, vector<32x32xf32>, vector<32x32xf32> -> vector<32x32xf32>
    %53 = arith.addf %52, %35 : vector<32x32xf32>
    %cst_18 = arith.constant dense<0xFF800000> : vector<32xf32>
    %54 = vector.multi_reduction <maximumf>, %53, %cst_18 [1] : vector<32x32xf32> to vector<32xf32>
    %55 = vector.shape_cast %54 : vector<32xf32> to vector<32x1xf32>
    %56 = vector.broadcast %55 : vector<32x1xf32> to vector<32x32xf32>
    %57 = arith.subf %53, %56 : vector<32x32xf32>
    %58 = math.exp %57 : vector<32x32xf32>
    %cst_19 = arith.constant dense<0.000000e+00> : vector<32xf32>
    %59 = vector.multi_reduction <add>, %58, %cst_19 [1] : vector<32x32xf32> to vector<32xf32>
    %60 = vector.shape_cast %59 : vector<32xf32> to vector<32x1xf32>
    %61 = tpu.reciprocal %60 {approx = true} : vector<32x1xf32> -> vector<32x1xf32>
    %62 = vector.broadcast %61 : vector<32x1xf32> to vector<32x32xf32>
    %63 = arith.mulf %58, %62 : vector<32x32xf32>
    %cst_20 = arith.constant dense<0.000000e+00> : vector<32x32xf32>
    %64 = tpu.matmul %63, %43, %cst_20 {dimension_numbers = #tpu.dot_dimension_numbers<[1], [0], [0], [1], [0, 0, 1, 1], [], []>} : vector<32x32xf32>, vector<32x32xf32>, vector<32x32xf32> -> vector<32x32xf32>
    %c0_i32_21 = arith.constant 0 : i32
    %65 = vector.broadcast %c0_i32_21 : i32 to vector<32x32xi32>
    %66 = arith.cmpi eq, %46, %65 : vector<32x32xi32>
    %cst_22 = arith.constant 0.000000e+00 : f32
    %67 = vector.broadcast %cst_22 : f32 to vector<32x32xf32>
    %68 = arith.select %66, %64, %67 : vector<32x32xi1>, vector<32x32xf32>
    %69 = arith.addf %47, %68 : vector<32x32xf32>
    %c1_i32 = arith.constant 1 : i32
    %70 = vector.broadcast %c1_i32 : i32 to vector<32x32xi32>
    %71 = arith.cmpi eq, %46, %70 : vector<32x32xi32>
    %cst_23 = arith.constant 0.000000e+00 : f32
    %72 = vector.broadcast %cst_23 : f32 to vector<32x32xf32>
    %73 = arith.select %71, %41, %72 : vector<32x32xi1>, vector<32x32xf32>
    %cst_24 = arith.constant dense<0.000000e+00> : vector<32x32xf32>
    %74 = tpu.matmul %73, %42, %cst_24 {dimension_numbers = #tpu.dot_dimension_numbers<[1], [1], [0], [0], [0, 0, 1, 0], [], []>} : vector<32x32xf32>, vector<32x32xf32>, vector<32x32xf32> -> vector<32x32xf32>
    %75 = arith.addf %74, %35 : vector<32x32xf32>
    %cst_25 = arith.constant dense<0xFF800000> : vector<32xf32>
    %76 = vector.multi_reduction <maximumf>, %75, %cst_25 [1] : vector<32x32xf32> to vector<32xf32>
    %77 = vector.shape_cast %76 : vector<32xf32> to vector<32x1xf32>
    %78 = vector.broadcast %77 : vector<32x1xf32> to vector<32x32xf32>
    %79 = arith.subf %75, %78 : vector<32x32xf32>
    %80 = math.exp %79 : vector<32x32xf32>
    %cst_26 = arith.constant dense<0.000000e+00> : vector<32xf32>
    %81 = vector.multi_reduction <add>, %80, %cst_26 [1] : vector<32x32xf32> to vector<32xf32>
    %82 = vector.shape_cast %81 : vector<32xf32> to vector<32x1xf32>
    %83 = tpu.reciprocal %82 {approx = true} : vector<32x1xf32> -> vector<32x1xf32>
    %84 = vector.broadcast %83 : vector<32x1xf32> to vector<32x32xf32>
    %85 = arith.mulf %80, %84 : vector<32x32xf32>
    %cst_27 = arith.constant dense<0.000000e+00> : vector<32x32xf32>
    %86 = tpu.matmul %85, %43, %cst_27 {dimension_numbers = #tpu.dot_dimension_numbers<[1], [0], [0], [1], [0, 0, 1, 1], [], []>} : vector<32x32xf32>, vector<32x32xf32>, vector<32x32xf32> -> vector<32x32xf32>
    %c1_i32_28 = arith.constant 1 : i32
    %87 = vector.broadcast %c1_i32_28 : i32 to vector<32x32xi32>
    %88 = arith.cmpi eq, %46, %87 : vector<32x32xi32>
    %cst_29 = arith.constant 0.000000e+00 : f32
    %89 = vector.broadcast %cst_29 : f32 to vector<32x32xf32>
    %90 = arith.select %88, %86, %89 : vector<32x32xi1>, vector<32x32xf32>
    %91 = arith.addf %69, %90 : vector<32x32xf32>
    %c2_i32 = arith.constant 2 : i32
    %92 = vector.broadcast %c2_i32 : i32 to vector<32x32xi32>
    %93 = arith.cmpi eq, %46, %92 : vector<32x32xi32>
    %cst_30 = arith.constant 0.000000e+00 : f32
    %94 = vector.broadcast %cst_30 : f32 to vector<32x32xf32>
    %95 = arith.select %93, %41, %94 : vector<32x32xi1>, vector<32x32xf32>
    %cst_31 = arith.constant dense<0.000000e+00> : vector<32x32xf32>
    %96 = tpu.matmul %95, %42, %cst_31 {dimension_numbers = #tpu.dot_dimension_numbers<[1], [1], [0], [0], [0, 0, 1, 0], [], []>} : vector<32x32xf32>, vector<32x32xf32>, vector<32x32xf32> -> vector<32x32xf32>
    %97 = arith.addf %96, %35 : vector<32x32xf32>
    %cst_32 = arith.constant dense<0xFF800000> : vector<32xf32>
    %98 = vector.multi_reduction <maximumf>, %97, %cst_32 [1] : vector<32x32xf32> to vector<32xf32>
    %99 = vector.shape_cast %98 : vector<32xf32> to vector<32x1xf32>
    %100 = vector.broadcast %99 : vector<32x1xf32> to vector<32x32xf32>
    %101 = arith.subf %97, %100 : vector<32x32xf32>
    %102 = math.exp %101 : vector<32x32xf32>
    %cst_33 = arith.constant dense<0.000000e+00> : vector<32xf32>
    %103 = vector.multi_reduction <add>, %102, %cst_33 [1] : vector<32x32xf32> to vector<32xf32>
    %104 = vector.shape_cast %103 : vector<32xf32> to vector<32x1xf32>
    %105 = tpu.reciprocal %104 {approx = true} : vector<32x1xf32> -> vector<32x1xf32>
    %106 = vector.broadcast %105 : vector<32x1xf32> to vector<32x32xf32>
    %107 = arith.mulf %102, %106 : vector<32x32xf32>
    %cst_34 = arith.constant dense<0.000000e+00> : vector<32x32xf32>
    %108 = tpu.matmul %107, %43, %cst_34 {dimension_numbers = #tpu.dot_dimension_numbers<[1], [0], [0], [1], [0, 0, 1, 1], [], []>} : vector<32x32xf32>, vector<32x32xf32>, vector<32x32xf32> -> vector<32x32xf32>
    %c2_i32_35 = arith.constant 2 : i32
    %109 = vector.broadcast %c2_i32_35 : i32 to vector<32x32xi32>
    %110 = arith.cmpi eq, %46, %109 : vector<32x32xi32>
    %cst_36 = arith.constant 0.000000e+00 : f32
    %111 = vector.broadcast %cst_36 : f32 to vector<32x32xf32>
    %112 = arith.select %110, %108, %111 : vector<32x32xi1>, vector<32x32xf32>
    %113 = arith.addf %91, %112 : vector<32x32xf32>
    %c3_i32_37 = arith.constant 3 : i32
    %114 = vector.broadcast %c3_i32_37 : i32 to vector<32x32xi32>
    %115 = arith.cmpi eq, %46, %114 : vector<32x32xi32>
    %cst_38 = arith.constant 0.000000e+00 : f32
    %116 = vector.broadcast %cst_38 : f32 to vector<32x32xf32>
    %117 = arith.select %115, %41, %116 : vector<32x32xi1>, vector<32x32xf32>
    %cst_39 = arith.constant dense<0.000000e+00> : vector<32x32xf32>
    %118 = tpu.matmul %117, %42, %cst_39 {dimension_numbers = #tpu.dot_dimension_numbers<[1], [1], [0], [0], [0, 0, 1, 0], [], []>} : vector<32x32xf32>, vector<32x32xf32>, vector<32x32xf32> -> vector<32x32xf32>
    %119 = arith.addf %118, %35 : vector<32x32xf32>
    %cst_40 = arith.constant dense<0xFF800000> : vector<32xf32>
    %120 = vector.multi_reduction <maximumf>, %119, %cst_40 [1] : vector<32x32xf32> to vector<32xf32>
    %121 = vector.shape_cast %120 : vector<32xf32> to vector<32x1xf32>
    %122 = vector.broadcast %121 : vector<32x1xf32> to vector<32x32xf32>
    %123 = arith.subf %119, %122 : vector<32x32xf32>
    %124 = math.exp %123 : vector<32x32xf32>
    %cst_41 = arith.constant dense<0.000000e+00> : vector<32xf32>
    %125 = vector.multi_reduction <add>, %124, %cst_41 [1] : vector<32x32xf32> to vector<32xf32>
    %126 = vector.shape_cast %125 : vector<32xf32> to vector<32x1xf32>
    %127 = tpu.reciprocal %126 {approx = true} : vector<32x1xf32> -> vector<32x1xf32>
    %128 = vector.broadcast %127 : vector<32x1xf32> to vector<32x32xf32>
    %129 = arith.mulf %124, %128 : vector<32x32xf32>
    %cst_42 = arith.constant dense<0.000000e+00> : vector<32x32xf32>
    %130 = tpu.matmul %129, %43, %cst_42 {dimension_numbers = #tpu.dot_dimension_numbers<[1], [0], [0], [1], [0, 0, 1, 1], [], []>} : vector<32x32xf32>, vector<32x32xf32>, vector<32x32xf32> -> vector<32x32xf32>
    %c3_i32_43 = arith.constant 3 : i32
    %131 = vector.broadcast %c3_i32_43 : i32 to vector<32x32xi32>
    %132 = arith.cmpi eq, %46, %131 : vector<32x32xi32>
    %cst_44 = arith.constant 0.000000e+00 : f32
    %133 = vector.broadcast %cst_44 : f32 to vector<32x32xf32>
    %134 = arith.select %132, %130, %133 : vector<32x32xi1>, vector<32x32xf32>
    %135 = arith.addf %113, %134 : vector<32x32xf32>
    %cst_45 = arith.constant dense<0.000000e+00> : vector<32x32xf32>
    %136 = tpu.matmul %135, %3, %cst_45 {dimension_numbers = #tpu.dot_dimension_numbers<[1], [0], [0], [1], [0, 0, 1, 1], [], []>} : vector<32x32xf32>, vector<32x32xf32>, vector<32x32xf32> -> vector<32x32xf32>
    %137 = vector.broadcast %11 : vector<1x32xf32> to vector<32x32xf32>
    %138 = arith.addf %136, %137 : vector<32x32xf32>
    %139 = arith.addf %0, %138 : vector<32x32xf32>
    %cst_46 = arith.constant dense<0.000000e+00> : vector<32xf32>
    %140 = vector.multi_reduction <add>, %139, %cst_46 [1] : vector<32x32xf32> to vector<32xf32>
    %141 = vector.shape_cast %140 : vector<32xf32> to vector<32x1xf32>
    %cst_47 = arith.constant 3.200000e+01 : f32
    %142 = vector.broadcast %cst_47 : f32 to vector<32x1xf32>
    %143 = arith.divf %141, %142 : vector<32x1xf32>
    %144 = vector.broadcast %143 : vector<32x1xf32> to vector<32x32xf32>
    %145 = arith.subf %139, %144 : vector<32x32xf32>
    %146 = arith.mulf %145, %145 : vector<32x32xf32>
    %cst_48 = arith.constant dense<0.000000e+00> : vector<32xf32>
    %147 = vector.multi_reduction <add>, %146, %cst_48 [1] : vector<32x32xf32> to vector<32xf32>
    %148 = vector.shape_cast %147 : vector<32xf32> to vector<32x1xf32>
    %cst_49 = arith.constant 3.200000e+01 : f32
    %149 = vector.broadcast %cst_49 : f32 to vector<32x1xf32>
    %150 = arith.divf %148, %149 : vector<32x1xf32>
    %151 = vector.broadcast %143 : vector<32x1xf32> to vector<32x32xf32>
    %152 = arith.subf %139, %151 : vector<32x32xf32>
    %cst_50 = arith.constant 9.99999974E-6 : f32
    %153 = vector.broadcast %cst_50 : f32 to vector<32x1xf32>
    %154 = arith.addf %150, %153 : vector<32x1xf32>
    %155 = math.rsqrt %154 : vector<32x1xf32>
    %156 = vector.broadcast %155 : vector<32x1xf32> to vector<32x32xf32>
    %157 = arith.mulf %152, %156 : vector<32x32xf32>
    %158 = vector.broadcast %12 : vector<1x32xf32> to vector<32x32xf32>
    %159 = arith.mulf %157, %158 : vector<32x32xf32>
    %160 = vector.broadcast %13 : vector<1x32xf32> to vector<32x32xf32>
    %161 = arith.addf %159, %160 : vector<32x32xf32>
    %cst_51 = arith.constant dense<0.000000e+00> : vector<32x64xf32>
    %162 = tpu.matmul %161, %6, %cst_51 {dimension_numbers = #tpu.dot_dimension_numbers<[1], [0], [0], [1], [0, 0, 1, 1], [], []>} : vector<32x32xf32>, vector<32x64xf32>, vector<32x64xf32> -> vector<32x64xf32>
    %163 = vector.broadcast %14 : vector<1x64xf32> to vector<32x64xf32>
    %164 = arith.addf %162, %163 : vector<32x64xf32>
    %cst_52 = arith.constant 0.000000e+00 : f32
    %165 = vector.broadcast %cst_52 : f32 to vector<32x64xf32>
    %166 = arith.maximumf %164, %165 : vector<32x64xf32>
    %cst_53 = arith.constant dense<0.000000e+00> : vector<32x32xf32>
    %167 = tpu.matmul %166, %8, %cst_53 {dimension_numbers = #tpu.dot_dimension_numbers<[1], [0], [0], [1], [0, 0, 1, 1], [], []>} : vector<32x64xf32>, vector<64x32xf32>, vector<32x32xf32> -> vector<32x32xf32>
    %168 = vector.broadcast %15 : vector<1x32xf32> to vector<32x32xf32>
    %169 = arith.addf %167, %168 : vector<32x32xf32>
    %170 = arith.addf %161, %169 : vector<32x32xf32>
    %cst_54 = arith.constant dense<0.000000e+00> : vector<32xf32>
    %171 = vector.multi_reduction <add>, %170, %cst_54 [1] : vector<32x32xf32> to vector<32xf32>
    %172 = vector.shape_cast %171 : vector<32xf32> to vector<32x1xf32>
    %cst_55 = arith.constant 3.200000e+01 : f32
    %173 = vector.broadcast %cst_55 : f32 to vector<32x1xf32>
    %174 = arith.divf %172, %173 : vector<32x1xf32>
    %175 = vector.broadcast %174 : vector<32x1xf32> to vector<32x32xf32>
    %176 = arith.subf %170, %175 : vector<32x32xf32>
    %177 = arith.mulf %176, %176 : vector<32x32xf32>
    %cst_56 = arith.constant dense<0.000000e+00> : vector<32xf32>
    %178 = vector.multi_reduction <add>, %177, %cst_56 [1] : vector<32x32xf32> to vector<32xf32>
    %179 = vector.shape_cast %178 : vector<32xf32> to vector<32x1xf32>
    %cst_57 = arith.constant 3.200000e+01 : f32
    %180 = vector.broadcast %cst_57 : f32 to vector<32x1xf32>
    %181 = arith.divf %179, %180 : vector<32x1xf32>
    %182 = vector.broadcast %174 : vector<32x1xf32> to vector<32x32xf32>
    %183 = arith.subf %170, %182 : vector<32x32xf32>
    %cst_58 = arith.constant 9.99999974E-6 : f32
    %184 = vector.broadcast %cst_58 : f32 to vector<32x1xf32>
    %185 = arith.addf %181, %184 : vector<32x1xf32>
    %186 = math.rsqrt %185 : vector<32x1xf32>
    %187 = vector.broadcast %186 : vector<32x1xf32> to vector<32x32xf32>
    %188 = arith.mulf %183, %187 : vector<32x32xf32>
    %189 = vector.broadcast %16 : vector<1x32xf32> to vector<32x32xf32>
    %190 = arith.mulf %188, %189 : vector<32x32xf32>
    %191 = vector.broadcast %17 : vector<1x32xf32> to vector<32x32xf32>
    %192 = arith.addf %190, %191 : vector<32x32xf32>
    %cst_59 = arith.constant dense<0.000000e+00> : vector<32x32xf32>
    %193 = tpu.matmul %192, %4, %cst_59 {dimension_numbers = #tpu.dot_dimension_numbers<[1], [0], [0], [1], [0, 0, 1, 1], [], []>} : vector<32x32xf32>, vector<32x32xf32>, vector<32x32xf32> -> vector<32x32xf32>
    %194 = vector.broadcast %18 : vector<1x32xf32> to vector<32x32xf32>
    %195 = arith.addf %193, %194 : vector<32x32xf32>
    %cst_60 = arith.constant 0.000000e+00 : f32
    %196 = vector.broadcast %cst_60 : f32 to vector<32x32xf32>
    %197 = arith.maximumf %195, %196 : vector<32x32xf32>
    %198 = vector.broadcast %19 : vector<1x32xf32> to vector<32x32xf32>
    %199 = arith.mulf %197, %198 : vector<32x32xf32>
    %cst_61 = arith.constant dense<0.000000e+00> : vector<32xf32>
    %200 = vector.multi_reduction <add>, %199, %cst_61 [1] : vector<32x32xf32> to vector<32xf32>
    %201 = vector.shape_cast %200 : vector<32xf32> to vector<32x1xf32>
    %202 = vector.broadcast %20 : vector<1x1xf32> to vector<32x1xf32>
    %203 = arith.addf %201, %202 : vector<32x1xf32>
    %204 = vector.extract_strided_slice %192 {offsets = [0, 0], sizes = [16, 32], strides = [1, 1]} : vector<32x32xf32> to vector<16x32xf32>
    %205 = vector.extract_strided_slice %203 {offsets = [0, 0], sizes = [16, 1], strides = [1, 1]} : vector<32x1xf32> to vector<16x1xf32>
    %cst_62 = arith.constant dense<0xFF800000> : vector<1xf32>
    %206 = vector.multi_reduction <maximumf>, %205, %cst_62 [0] : vector<16x1xf32> to vector<1xf32>
    %207 = vector.shape_cast %206 : vector<1xf32> to vector<1x1xf32>
    %208 = vector.broadcast %207 : vector<1x1xf32> to vector<16x1xf32>
    %209 = arith.subf %205, %208 : vector<16x1xf32>
    %210 = math.exp %209 : vector<16x1xf32>
    %cst_63 = arith.constant dense<0.000000e+00> : vector<1xf32>
    %211 = vector.multi_reduction <add>, %210, %cst_63 [0] : vector<16x1xf32> to vector<1xf32>
    %212 = vector.shape_cast %211 : vector<1xf32> to vector<1x1xf32>
    %213 = tpu.reciprocal %212 {approx = true} : vector<1x1xf32> -> vector<1x1xf32>
    %214 = vector.broadcast %213 : vector<1x1xf32> to vector<16x1xf32>
    %215 = arith.mulf %210, %214 : vector<16x1xf32>
    %216 = vector.broadcast %215 : vector<16x1xf32> to vector<16x32xf32>
    %217 = arith.mulf %204, %216 : vector<16x32xf32>
    %cst_64 = arith.constant dense<0.000000e+00> : vector<32xf32>
    %218 = vector.multi_reduction <add>, %217, %cst_64 [0] : vector<16x32xf32> to vector<32xf32>
    %219 = vector.shape_cast %218 : vector<32xf32> to vector<1x32xf32>
    %220 = vector.extract_strided_slice %192 {offsets = [16, 0], sizes = [16, 32], strides = [1, 1]} : vector<32x32xf32> to vector<16x32xf32>
    %221 = vector.extract_strided_slice %203 {offsets = [16, 0], sizes = [16, 1], strides = [1, 1]} : vector<32x1xf32> to vector<16x1xf32>
    %cst_65 = arith.constant dense<0xFF800000> : vector<1xf32>
    %222 = vector.multi_reduction <maximumf>, %221, %cst_65 [0] : vector<16x1xf32> to vector<1xf32>
    %223 = vector.shape_cast %222 : vector<1xf32> to vector<1x1xf32>
    %224 = vector.broadcast %223 : vector<1x1xf32> to vector<16x1xf32>
    %225 = arith.subf %221, %224 : vector<16x1xf32>
    %226 = math.exp %225 : vector<16x1xf32>
    %cst_66 = arith.constant dense<0.000000e+00> : vector<1xf32>
    %227 = vector.multi_reduction <add>, %226, %cst_66 [0] : vector<16x1xf32> to vector<1xf32>
    %228 = vector.shape_cast %227 : vector<1xf32> to vector<1x1xf32>
    %229 = tpu.reciprocal %228 {approx = true} : vector<1x1xf32> -> vector<1x1xf32>
    %230 = vector.broadcast %229 : vector<1x1xf32> to vector<16x1xf32>
    %231 = arith.mulf %226, %230 : vector<16x1xf32>
    %232 = vector.broadcast %231 : vector<16x1xf32> to vector<16x32xf32>
    %233 = arith.mulf %220, %232 : vector<16x32xf32>
    %cst_67 = arith.constant dense<0.000000e+00> : vector<32xf32>
    %234 = vector.multi_reduction <add>, %233, %cst_67 [0] : vector<16x32xf32> to vector<32xf32>
    %235 = vector.shape_cast %234 : vector<32xf32> to vector<1x32xf32>
    %236 = tpu.concatenate %219, %235 in 0 : vector<1x32xf32>, vector<1x32xf32> -> vector<2x32xf32>
    %cst_68 = arith.constant dense<0.000000e+00> : vector<2x32xf32>
    %237 = tpu.matmul %236, %5, %cst_68 {dimension_numbers = #tpu.dot_dimension_numbers<[1], [0], [0], [1], [0, 0, 1, 1], [], []>} : vector<2x32xf32>, vector<32x32xf32>, vector<2x32xf32> -> vector<2x32xf32>
    %238 = vector.broadcast %21 : vector<1x32xf32> to vector<2x32xf32>
    %239 = arith.addf %237, %238 : vector<2x32xf32>
    %cst_69 = arith.constant dense<0.000000e+00> : vector<2xf32>
    %240 = vector.multi_reduction <add>, %239, %cst_69 [1] : vector<2x32xf32> to vector<2xf32>
    %241 = vector.shape_cast %240 : vector<2xf32> to vector<2x1xf32>
    %cst_70 = arith.constant 3.200000e+01 : f32
    %242 = vector.broadcast %cst_70 : f32 to vector<2x1xf32>
    %243 = arith.divf %241, %242 : vector<2x1xf32>
    %244 = vector.broadcast %243 : vector<2x1xf32> to vector<2x32xf32>
    %245 = arith.subf %239, %244 : vector<2x32xf32>
    %246 = arith.mulf %245, %245 : vector<2x32xf32>
    %cst_71 = arith.constant dense<0.000000e+00> : vector<2xf32>
    %247 = vector.multi_reduction <add>, %246, %cst_71 [1] : vector<2x32xf32> to vector<2xf32>
    %248 = vector.shape_cast %247 : vector<2xf32> to vector<2x1xf32>
    %cst_72 = arith.constant 3.200000e+01 : f32
    %249 = vector.broadcast %cst_72 : f32 to vector<2x1xf32>
    %250 = arith.divf %248, %249 : vector<2x1xf32>
    %251 = vector.broadcast %243 : vector<2x1xf32> to vector<2x32xf32>
    %252 = arith.subf %239, %251 : vector<2x32xf32>
    %cst_73 = arith.constant 9.99999974E-6 : f32
    %253 = vector.broadcast %cst_73 : f32 to vector<2x1xf32>
    %254 = arith.addf %250, %253 : vector<2x1xf32>
    %255 = math.rsqrt %254 : vector<2x1xf32>
    %256 = vector.broadcast %255 : vector<2x1xf32> to vector<2x32xf32>
    %257 = arith.mulf %252, %256 : vector<2x32xf32>
    %258 = vector.broadcast %22 : vector<1x32xf32> to vector<2x32xf32>
    %259 = arith.mulf %257, %258 : vector<2x32xf32>
    %260 = vector.broadcast %23 : vector<1x32xf32> to vector<2x32xf32>
    %261 = arith.addf %259, %260 : vector<2x32xf32>
    %cst_74 = arith.constant dense<0.000000e+00> : vector<2x128xf32>
    %262 = tpu.matmul %261, %7, %cst_74 {dimension_numbers = #tpu.dot_dimension_numbers<[1], [0], [0], [1], [0, 0, 1, 1], [], []>} : vector<2x32xf32>, vector<32x128xf32>, vector<2x128xf32> -> vector<2x128xf32>
    %263 = vector.broadcast %24 : vector<1x128xf32> to vector<2x128xf32>
    %264 = arith.addf %262, %263 : vector<2x128xf32>
    %cst_75 = arith.constant dense<0xFF800000> : vector<2xf32>
    %265 = vector.multi_reduction <maximumf>, %264, %cst_75 [1] : vector<2x128xf32> to vector<2xf32>
    %266 = vector.shape_cast %265 : vector<2xf32> to vector<2x1xf32>
    %267 = vector.broadcast %266 : vector<2x1xf32> to vector<2x128xf32>
    %268 = arith.subf %264, %267 : vector<2x128xf32>
    %269 = math.exp %268 : vector<2x128xf32>
    %cst_76 = arith.constant dense<0.000000e+00> : vector<2xf32>
    %270 = vector.multi_reduction <add>, %269, %cst_76 [1] : vector<2x128xf32> to vector<2xf32>
    %271 = vector.shape_cast %270 : vector<2xf32> to vector<2x1xf32>
    %272 = math.log %271 : vector<2x1xf32>
    %273 = vector.broadcast %272 : vector<2x1xf32> to vector<2x128xf32>
    %274 = arith.subf %268, %273 : vector<2x128xf32>
    %c0_77 = arith.constant 0 : index
    %c0_78 = arith.constant 0 : index
    %275 = vector.load %arg3[%c0_77, %c0_78] : memref<2x128xf32, #tpu.memory_space<vmem>>, vector<2x128xf32>
    tpu.vector_store %arg3[%c0_77, %c0_78], %274 {strides = array<i32>} : memref<2x128xf32, #tpu.memory_space<vmem>>, vector<2x128xf32>,
    return
  }
}

</mosaic_0001>

<bundles_post_ra>
// kernel: vanilla_transformer_forward.1
= control target key start
LH: loop header
LB: loop body
LE: loop exit
PB: predicated region body
PF: predicated region fallthrough
CT: control target
= control target key end

     0   :  { %8 = vsyncpa [#allocation3], 0  ;;  %s2099_s0 = inlined_call_operand.vmem [shape: f32[32,32], index: 0, kind: input, shape index: {}]   ;;  %s2100_s1 = inlined_call_operand.vmem [shape: f32[1,32], index: 1, kind: input, shape index: {}]   ;;  %s2101_s2 = inlined_call_operand.hbm [shape: f32[272,128], index: 2, kind: input, shape index: {}]   ;;  %s2102_s3 = inlined_call_operand.hbm [shape: f32[2,128], index: 3, kind: output, shape index: {}]  }
   0x1   :  { %9 = vsyncpa [#allocation4], 0  ;;  %s18_s14 = sshll.u32 %s2101_s2, 4  ;;  %s1592_s15 = smov [#allocation2]   ;;  %s19_s14 = int_to_ptr.hbm [resolvable:$true] %s18_s14 }
   0x2   :  { %s20_s16 = sshll.u32 %s1592_s15, 4  ;;  %s1593_s17 = smov 128   ;;  %s21_s16 = int_to_ptr.vmem [resolvable:$true] %s20_s16 }
   0x3   :  { %s1594_s18 = smov 8  }
   0x4   :  { %26 = dma.hbm_to_vmem [thread:$0]  %s19_s14, 4352, %s21_s16, [#allocation3], %s1593_s17, %s1593_s17, %s1594_s18  }
   0x5   :  { %1588 = dma.done.wait [#allocation3], 4352  }
   0x6   :  { %1589 = vsyncadd [#allocation3], 4294962944  ;;  %v39_v0 = vld [vmem:[#allocation2 + $0x18] sm:$0xff]  ;;  %v38_v1 = vld [vmem:[#allocation2 + $0x10] sm:$0xff]  ;;  %vm94_vm0 = vcmask 261120   ;;  %s1595_s26 = smov 96   ;;  %v70_v22 = vlaneseq }
   0x7   :  { %119 = vmatpush.msra.mxu0 %v39_v0  ;;  %1413 = vmatpush.msra.mxu3 %v39_v0  ;;  %v37_v2 = vld [vmem:[#allocation2 + $0x8] sm:$0xff]  ;;  %v36_v3 = vld [vmem:[#allocation2] sm:$0xff]  ;;  %v1631_v5 = vld [vmem:[%s2099_s0 + $0x10] sm:$0xff]  ;;  %s1599_s28 = smov [#allocation5]   ;;  %s1333_s5 = sshll.u32 %s2102_s3, 4  ;;  %s1334_s5 = int_to_ptr.hbm [resolvable:$true] %s1333_s5 }
   0x8   :  { %v1626_v4 = vld [vmem:[%s2099_s0] sm:$0xff]  ;;  %v1640_v6 = vld [vmem:[%s2099_s0 + $0x8] sm:$0xff]  ;;  %v1645_v7 = vld [vmem:[%s2099_s0 + $0x18] sm:$0xff]  ;;  %v76_v24 = vand.u32 127, %v70_v22  ;;  %v71_v43 = vshrl.u32 %v70_v22, 7  ;;  %s1331_s29 = sshll.u32 %s1599_s28, 4  ;;  %s1332_s29 = int_to_ptr.vmem [resolvable:$true] %s1331_s29 }
   0x9   :  { %120 = vmatpush.msra.mxu0 %v38_v1  ;;  %1414 = vmatpush.msra.mxu3 %v38_v1  ;;  %v1651_v9 = vld [vmem:[#allocation2 + $0x100] sm:$0xff] }
   0xa   :  { %v93_v10 = vperm.slane %v1651_v9, 0  ;;  %v1688_v25 = vshrl.u32 %v76_v24, 3  ;;  %v77_v44 = vshrl.u32 %v71_v43, 4  ;;  %v81_v45 = vshrl.u32 %v76_v24, 4  ;;  %v1438_v46 = vld [vmem:[%s2100_s1] ss:$0 sm:$0xff] }
   0xb   :  { %121 = vmatpush.msra.mxu0 %v37_v2  ;;  %1415 = vmatpush.msra.mxu3 %v37_v2  ;;  %v72_v47 = vadd.s32 8, %v71_v43  ;;  %v73_v53 = vadd.s32 16, %v71_v43  ;;  %v74_v59 = vadd.s32 24, %v71_v43  ;;  %s1596_s1 = smov 64  }
   0xc   :  { %vm141_vm1 = vcmp.eq.s32.totalorder %v1688_v25, 0  ;;  %vm312_vm2 = vcmp.eq.s32.totalorder %v1688_v25, 1  ;;  %vm590_vm3 = vcmp.eq.s32.totalorder %v1688_v25, 3  ;;  %vm82_vm4 = vcmp.eq.s32.totalorder %v77_v44, %v81_v45 }
   0xd   :  { %122 = vmatpush.msra.mxu0 %v36_v3  ;;  %1416 = vmatpush.msra.mxu3 %v36_v3  ;;  %v1770_v48 = vsel %vm82_vm4, %v1438_v46, -1e+09  ;;  %v78_v49 = vshrl.u32 %v72_v47, 4  ;;  %v79_v55 = vshrl.u32 %v73_v53, 4  ;;  %v80_v61 = vshrl.u32 %v74_v59, 4 }
   0xe   :  { %1343 = vmatmul.msk.f32.vlgmr.msra.gmra.mxu0 %vm94_vm0, %v1626_v4  ;;  %1345 = vmatmul.msk.f32.vlgmr.msra.gmra.mxu3 %vm94_vm0, %v1631_v5  ;;  %vm451_vm8 = vcmp.eq.s32.totalorder %v1688_v25, 2 }
   0xf   :  { %vm83_vm5 = vcmp.eq.s32.totalorder %v78_v49, %v81_v45  ;;  %vm84_vm6 = vcmp.eq.s32.totalorder %v79_v55, %v81_v45  ;;  %vm85_vm7 = vcmp.eq.s32.totalorder %v80_v61, %v81_v45 }
  0x10   :  { %v1774_v54 = vsel %vm83_vm5, %v1438_v46, -1e+09  ;;  %v1778_v60 = vsel %vm84_vm6, %v1438_v46, -1e+09  ;;  %v1782_v1 = vsel %vm85_vm7, %v1438_v46, -1e+09 }
  0x11   :  { %vm927_vm7 = vcmask 523264  }
  0x16   :  { %1344 = vmatmul.msk.f32.gmra.mxu0 %vm94_vm0, %v1640_v6  ;;  %1346 = vmatmul.msk.f32.gmra.mxu3 %vm94_vm0, %v1645_v7 }
  0x8b   :  { %v124_v8 = vpop.f32.mrf.mxu0 }
  0x8c   :  { %v1654_v12 = vadd.f32 %v124_v8, %v93_v10 }
  0x8e   :  { %v1691_v26 = vmul.f32 0.35355338, %v1654_v12 }
  0x90   :  { %v142_v28 = vsel %vm141_vm1, %v1691_v26, 0.0  ;;  %v313_v29 = vsel %vm312_vm2, %v1691_v26, 0.0  ;;  %v591_v39 = vsel %vm590_vm3, %v1691_v26, 0.0 }
  0x91   :  { %v130_v11 = vpop.f32.mrf.mxu3 }
  0x92   :  { %v1661_v17 = vadd.f32 %v130_v11, %v93_v10 }
  0x93   :  { %v127_v13 = vpop.f32.mrf.mxu0 }
  0x94   :  { %v1656_v14 = vadd.f32 %v127_v13, %v93_v10  ;;  %v1729_v33 = vmul.f32 0.35355338, %v1661_v17 }
  0x96   :  { %152 = vrot.lane.b32.xlu1 %v1656_v14, %s1595_s26  ;;  %v1430_v15 = vpack.i.bf16 %v1654_v12, %v1656_v14  ;;  %v1714_v30 = vmul.f32 0.35355338, %v1656_v14  ;;  %v144_v34 = vsel %vm141_vm1, %v1729_v33, 0.0  ;;  %v315_v35 = vsel %vm312_vm2, %v1729_v33, 0.0 }
  0x97   :  { %v593_v41 = vsel %vm590_vm3, %v1729_v33, 0.0 }
  0x98   :  { %v143_v31 = vsel %vm141_vm1, %v1714_v30, 0.0  ;;  %v314_v32 = vsel %vm312_vm2, %v1714_v30, 0.0  ;;  %v592_v40 = vsel %vm590_vm3, %v1714_v30, 0.0 }
  0x99   :  { %v133_v16 = vpop.f32.mrf.mxu3 }
  0x9a   :  { %v1663_v18 = vadd.f32 %v133_v16, %v93_v10 }
  0x9c   :  { %156 = vrot.lane.b32.xlu0 %v1663_v18, %s1595_s26  ;;  %v1425_v19 = vpack.i.bf16 %v1661_v17, %v1663_v18  ;;  %v1740_v36 = vmul.f32 0.35355338, %v1663_v18 }
  0x9e   :  { %150 = vrot.lane.b32.xlu1 %v1654_v12, %s1595_s26  ;;  %v145_v37 = vsel %vm141_vm1, %v1740_v36, 0.0  ;;  %v316_v38 = vsel %vm312_vm2, %v1740_v36, 0.0  ;;  %v594_v42 = vsel %vm590_vm3, %v1740_v36, 0.0 }
  0xa4   :  { %154 = vrot.lane.b32.xlu0 %v1661_v17, %s1595_s26 }
 0x108   :  { %v1676_v21 = vpop.permute.xlu1 %152 }
 0x10e   :  { %v1670_v20 = vpop.permute.xlu0 %156 }
 0x10f   :  { %1347 = vmatpush.xpose.msk.msra.mxu1 %vm94_vm0, %v1670_v20  ;;  %1359 = vmatpush.xpose.msk.msrb.mxu3 %vm94_vm0, %v1670_v20 }
 0x110   :  { %v1693_v27 = vpop.permute.xlu1 %150 }
 0x116   :  { %v1678_v23 = vpop.permute.xlu0 %154 }
 0x117   :  { %1348 = vmatpush.xpose.msk.msra.mxu1 %vm94_vm0, %v1678_v23  ;;  %1360 = vmatpush.xpose.msk.msrb.mxu3 %vm94_vm0, %v1678_v23 }
 0x11b   :  { %1349 = vmatpush.xpose.msk.msra.mxu1 %vm94_vm0, %v1676_v21  ;;  %1361 = vmatpush.xpose.msk.msrb.mxu3 %vm94_vm0, %v1676_v21 }
 0x11f   :  { %1350 = vmatpush.xpose.msk.msra.mxu1 %vm94_vm0, %v1693_v27  ;;  %1362 = vmatpush.xpose.msk.msrb.mxu3 %vm94_vm0, %v1693_v27 }
 0x122   :  { %1351 = vmatmul.msk.f32.vlgmr.msra.gmra.mxu1 %vm94_vm0, %v142_v28  ;;  %1363 = vmatmul.msk.f32.vlgmr.msrb.gmra.mxu3 %vm94_vm0, %v313_v29 }
 0x123   :  { %1383 = vmatpush.xpose.msk.msra.mxu3 %vm94_vm0, %v1670_v20 }
 0x127   :  { %1384 = vmatpush.xpose.msk.msra.mxu3 %vm94_vm0, %v1678_v23 }
 0x12a   :  { %1352 = vmatmul.msk.f32.gmra.mxu1 %vm94_vm0, %v143_v31  ;;  %1364 = vmatmul.msk.f32.gmra.mxu3 %vm94_vm0, %v314_v32 }
 0x12b   :  { %1385 = vmatpush.xpose.msk.msra.mxu3 %vm94_vm0, %v1676_v21 }
 0x12f   :  { %1386 = vmatpush.xpose.msk.msra.mxu3 %vm94_vm0, %v1693_v27 }
 0x132   :  { %1353 = vmatmul.msk.f32.gmra.mxu1 %vm94_vm0, %v144_v34  ;;  %1365 = vmatmul.msk.f32.gmra.mxu3 %vm94_vm0, %v315_v35 }
 0x13a   :  { %1354 = vmatmul.msk.f32.gmra.mxu1 %vm94_vm0, %v145_v37  ;;  %1366 = vmatmul.msk.f32.gmra.mxu3 %vm94_vm0, %v316_v38 }
 0x142   :  { %1387 = vmatmul.msk.f32.vlgmr.msra.gmra.mxu3 %vm94_vm0, %v591_v39 }
 0x14a   :  { %1388 = vmatmul.msk.f32.gmra.mxu3 %vm94_vm0, %v592_v40 }
 0x152   :  { %1389 = vmatmul.msk.f32.gmra.mxu3 %vm94_vm0, %v593_v41 }
 0x15a   :  { %1390 = vmatmul.msk.f32.gmra.mxu3 %vm94_vm0, %v594_v42 }
 0x19f   :  { %v195_v50 = vpop.f32.mrf.mxu1 }
 0x1a0   :  { %v196_v51 = vadd.f32 %v195_v50, %v1770_v48 }
 0x1a2   :  { %v207_v52 = vsel %vm94_vm0, %v196_v51, -inf }
 0x1a3   :  { %208 = vmax.xlane.f32.xlu2 %v207_v52 }
 0x1a5   :  { %v346_v28 = vpop.f32.mrf.mxu3 }
 0x1a6   :  { %v347_v46 = vadd.f32 %v346_v28, %v1770_v48 }
 0x1a7   :  { %v198_v56 = vpop.f32.mrf.mxu1 }
 0x1a8   :  { %v199_v57 = vadd.f32 %v198_v56, %v1774_v54  ;;  %v358_v50 = vsel %vm94_vm0, %v347_v46, -inf }
 0x1aa   :  { %v210_v58 = vsel %vm94_vm0, %v199_v57, -inf }
 0x1ab   :  { %211 = vmax.xlane.f32.xlu2 %v210_v58 }
 0x1ad   :  { %v349_v35 = vpop.f32.mrf.mxu3 }
 0x1af   :  { %v201_v62 = vpop.f32.mrf.mxu1 }
 0x1b0   :  { %v202_v63 = vadd.f32 %v201_v62, %v1778_v60 }
 0x1b2   :  { %v213_v0 = vsel %vm94_vm0, %v202_v63, -inf }
 0x1b3   :  { %214 = vmax.xlane.f32.xlu0 %v213_v0 }
 0x1b5   :  { %v352_v45 = vpop.f32.mrf.mxu3 }
 0x1b7   :  { %v204_v2 = vpop.f32.mrf.mxu1 }
 0x1b8   :  { %v205_v3 = vadd.f32 %v204_v2, %v1782_v1 }
 0x1ba   :  { %v216_v8 = vsel %vm94_vm0, %v205_v3, -inf }
 0x1bb   :  { %217 = vmax.xlane.f32.xlu1 %v216_v8 }
 0x1bd   :  { %v355_v52 = vpop.f32.mrf.mxu3 }
 0x1be   :  { %v1820_v55 = vadd.f32 %v355_v52, %v1782_v1 }
 0x1c0   :  { %v367_v56 = vsel %vm94_vm0, %v1820_v55, -inf }
 0x1c3   :  { %1426 = vrot.lane.b32.xlu2 %v1425_v19, %s1596_s1 }
 0x1cb   :  { %1431 = vrot.lane.b32.xlu2 %v1430_v15, %s1596_s1 }
 0x216   :  { %v209_v10 = vpop.xlane.xlu2 %208 }
 0x217   :  { %v219_v11 = vsub.f32 %v196_v51, %v209_v10  ;;  %v1812_v51 = vadd.f32 %v352_v45, %v1778_v60 }
 0x219   :  { %v223_v13 = vmul.f32 1.442695, %v219_v11  ;;  %v364_v53 = vsel %vm94_vm0, %v1812_v51, -inf }
 0x21b   :  { %1439 = vpow2.f32 %v223_v13 }
 0x21e   :  { %v212_v16 = vpop.xlane.xlu2 %211 }
 0x21f   :  { %v220_v22 = vsub.f32 %v199_v57, %v212_v16 }
 0x221   :  { %v1792_v24 = vpop.eup %1439  ;;  %v225_v29 = vmul.f32 1.442695, %v220_v22 }
 0x222   :  { %v231_v31 = vsel %vm94_vm0, %v1792_v24, 0.0 }
 0x223   :  { %1441 = vpow2.f32 %v225_v29  ;;  %232 = vadd.xlane.f32.xlu2 %v231_v31 }
 0x226   :  { %v215_v17 = vpop.xlane.xlu0 %214  ;;  %v1427_v18 = vpop.permute.xlu2 %1426 }
 0x227   :  { %v221_v19 = vsub.f32 %v202_v63, %v215_v17  ;;  %v1428_v12 = vunpack.i.l.bf16 %v1427_v18  ;;  %v1429_v32 = vunpack.i.h.bf16 %v1427_v18 }
 0x229   :  { %v1796_v14 = vpop.eup %1441  ;;  %v227_v15 = vmul.f32 1.442695, %v221_v19  ;;  %287 = vmatpush.msra.mxu2 %v1428_v12  ;;  %426 = vmatpush.msrb.mxu0 %v1428_v12 }
 0x22a   :  { %565 = vmatpush.msrb.mxu1 %v1428_v12  ;;  %v234_v34 = vsel %vm94_vm0, %v1796_v14, 0.0 }
 0x22b   :  { %1443 = vpow2.f32 %v227_v15  ;;  %235 = vadd.xlane.f32.xlu2 %v234_v34  ;;  %288 = vmatpush.msra.mxu2 %v1429_v32  ;;  %v452_v15 = vsel %vm451_vm8, %v1691_v26, 0.0  ;;  %v455_v26 = vsel %vm451_vm8, %v1740_v36, 0.0 }
 0x22c   :  { %427 = vmatpush.msrb.mxu0 %v1429_v32  ;;  %566 = vmatpush.msrb.mxu1 %v1429_v32 }
 0x22e   :  { %v218_v37 = vpop.xlane.xlu1 %217  ;;  %v1432_v38 = vpop.permute.xlu2 %1431 }
 0x22f   :  { %v222_v39 = vsub.f32 %v205_v3, %v218_v37  ;;  %v1433_v40 = vunpack.i.l.bf16 %v1432_v38  ;;  %v1434_v43 = vunpack.i.h.bf16 %v1432_v38  ;;  %v454_v37 = vsel %vm451_vm8, %v1729_v33, 0.0 }
 0x231   :  { %v1444_v41 = vpop.eup %1443  ;;  %v229_v42 = vmul.f32 1.442695, %v222_v39  ;;  %289 = vmatpush.msra.mxu2 %v1433_v40  ;;  %428 = vmatpush.msrb.mxu0 %v1433_v40 }
 0x232   :  { %567 = vmatpush.msrb.mxu1 %v1433_v40  ;;  %v237_v44 = vsel %vm94_vm0, %v1444_v41, 0.0 }
 0x233   :  { %1445 = vpow2.f32 %v229_v42  ;;  %238 = vadd.xlane.f32.xlu0 %v237_v44  ;;  %290 = vmatpush.msra.mxu2 %v1434_v43 }
 0x234   :  { %429 = vmatpush.msrb.mxu0 %v1434_v43  ;;  %568 = vmatpush.msrb.mxu1 %v1434_v43 }
 0x235   :  { %1371 = vmatpush.xpose.msk.msrb.mxu2 %vm94_vm0, %v1670_v20  ;;  %v350_v20 = vadd.f32 %v349_v35, %v1774_v54  ;;  %v453_v35 = vsel %vm451_vm8, %v1714_v30, 0.0 }
 0x236   :  { %704 = vmatpush.msra.mxu0 %v1428_v12 }
 0x238   :  { %705 = vmatpush.msra.mxu0 %v1429_v32 }
 0x239   :  { %v1446_v47 = vpop.eup %1445  ;;  %1372 = vmatpush.xpose.msk.msrb.mxu2 %vm94_vm0, %v1678_v23  ;;  %v361_v23 = vsel %vm94_vm0, %v350_v20, -inf }
 0x23a   :  { %706 = vmatpush.msra.mxu0 %v1433_v40  ;;  %v240_v49 = vsel %vm94_vm0, %v1446_v47, 0.0 }
 0x23b   :  { %241 = vadd.xlane.f32.xlu1 %v240_v49  ;;  %359 = vmax.xlane.f32.xlu0 %v358_v50 }
 0x23c   :  { %707 = vmatpush.msra.mxu0 %v1434_v43 }
 0x23d   :  { %1373 = vmatpush.xpose.msk.msrb.mxu2 %vm94_vm0, %v1676_v21  ;;  %v624_v21 = vpop.f32.mrf.mxu3 }
 0x23e   :  { %v1825_v57 = vadd.f32 %v624_v21, %v1770_v48 }
 0x241   :  { %1374 = vmatpush.xpose.msk.msrb.mxu2 %vm94_vm0, %v1693_v27  ;;  %v636_v27 = vsel %vm94_vm0, %v1825_v57, -inf }
 0x243   :  { %362 = vmax.xlane.f32.xlu1 %v361_v23  ;;  %365 = vmax.xlane.f32.xlu0 %v364_v53 }
 0x245   :  { %v627_v58 = vpop.f32.mrf.mxu3 }
 0x246   :  { %v1830_v59 = vadd.f32 %v627_v58, %v1774_v54 }
 0x248   :  { %v639_v61 = vsel %vm94_vm0, %v1830_v59, -inf }
 0x24b   :  { %368 = vmax.xlane.f32.xlu1 %v367_v56 }
 0x24d   :  { %v630_v53 = vpop.f32.mrf.mxu3 }
 0x253   :  { %637 = vmax.xlane.f32.xlu1 %v636_v27  ;;  %v631_v27 = vadd.f32 %v630_v53, %v1778_v60 }
 0x25b   :  { %640 = vmax.xlane.f32.xlu1 %v639_v61 }
 0x296   :  { %v233_v62 = vpop.xlane.xlu2 %232 }
 0x297   :  { %1447 = vrcp.f32 %v233_v62 }
 0x29d   :  { %v1448_v63 = vpop.eup %1447 }
 0x29e   :  { %v236_v0 = vpop.xlane.xlu2 %235  ;;  %v247_v2 = vmul.f32 %v1448_v63, %v1792_v24 }
 0x29f   :  { %1449 = vrcp.f32 %v236_v0  ;;  %v642_v0 = vsel %vm94_vm0, %v631_v27, -inf }
 0x2a0   :  { %1355 = vmatmul.msk.f32.vlgmr.msra.gmra.mxu2 %vm94_vm0, %v247_v2  ;;  %v633_v2 = vpop.f32.mrf.mxu3 }
 0x2a5   :  { %v1450_v3 = vpop.eup %1449 }
 0x2a6   :  { %v239_v8 = vpop.xlane.xlu0 %238  ;;  %v248_v10 = vmul.f32 %v1450_v3, %v1796_v14 }
 0x2a7   :  { %1451 = vrcp.f32 %v239_v8  ;;  %v634_v8 = vadd.f32 %v633_v2, %v1782_v1 }
 0x2a8   :  { %1356 = vmatmul.msk.f32.gmra.mxu2 %vm94_vm0, %v248_v10 }
 0x2ad   :  { %v1452_v11 = vpop.eup %1451 }
 0x2ae   :  { %v242_v13 = vpop.xlane.xlu1 %241  ;;  %v249_v16 = vmul.f32 %v1452_v11, %v1444_v41  ;;  %v360_v22 = vpop.xlane.xlu0 %359 }
 0x2af   :  { %1453 = vrcp.f32 %v242_v13  ;;  %v370_v28 = vsub.f32 %v347_v46, %v360_v22 }
 0x2b0   :  { %1357 = vmatmul.msk.f32.gmra.mxu2 %vm94_vm0, %v249_v16 }
 0x2b1   :  { %v374_v29 = vmul.f32 1.442695, %v370_v28 }
 0x2b3   :  { %1455 = vpow2.f32 %v374_v29 }
 0x2b5   :  { %v1454_v24 = vpop.eup %1453 }
 0x2b6   :  { %v363_v31 = vpop.xlane.xlu1 %362  ;;  %v250_v17 = vmul.f32 %v1454_v24, %v1446_v47  ;;  %v366_v56 = vpop.xlane.xlu0 %365 }
 0x2b7   :  { %v371_v18 = vsub.f32 %v350_v20, %v363_v31  ;;  %v372_v61 = vsub.f32 %v1812_v51, %v366_v56 }
 0x2b8   :  { %1358 = vmatmul.msk.f32.gmra.mxu2 %vm94_vm0, %v250_v17 }
 0x2b9   :  { %v376_v19 = vmul.f32 1.442695, %v371_v18  ;;  %v1456_v12 = vpop.eup %1455 }
 0x2ba   :  { %v382_v14 = vsel %vm94_vm0, %v1456_v12, 0.0 }
 0x2bb   :  { %1457 = vpow2.f32 %v376_v19  ;;  %383 = vadd.xlane.f32.xlu1 %v382_v14 }
 0x2be   :  { %v369_v38 = vpop.xlane.xlu1 %368 }
 0x2c0   :  { %1375 = vmatmul.msk.f32.vlgmr.msrb.gmra.mxu2 %vm94_vm0, %v452_v15 }
 0x2c1   :  { %v1458_v32 = vpop.eup %1457 }
 0x2c2   :  { %v385_v34 = vsel %vm94_vm0, %v1458_v32, 0.0 }
 0x2c3   :  { %386 = vadd.xlane.f32.xlu1 %v385_v34 }
 0x2c6   :  { %v638_v39 = vpop.xlane.xlu1 %637 }
 0x2c8   :  { %1376 = vmatmul.msk.f32.gmra.mxu2 %vm94_vm0, %v453_v35 }
 0x2ce   :  { %v641_v41 = vpop.xlane.xlu1 %640 }
 0x2cf   :  { %v649_v17 = vsub.f32 %v1830_v59, %v641_v41 }
 0x2d0   :  { %1377 = vmatmul.msk.f32.gmra.mxu2 %vm94_vm0, %v454_v37 }
 0x2d1   :  { %v654_v19 = vmul.f32 1.442695, %v649_v17 }
 0x2d8   :  { %1378 = vmatmul.msk.f32.gmra.mxu2 %vm94_vm0, %v455_v26 }
 0x323   :  { %v1859_v40 = vpop.f32.mrf.mxu2 }
 0x32b   :  { %v1861_v30 = vpop.f32.mrf.mxu2 }
 0x32e   :  { %v384_v42 = vpop.xlane.xlu1 %383 }
 0x32f   :  { %1459 = vrcp.f32 %v384_v42 }
 0x333   :  { %v1863_v43 = vpop.f32.mrf.mxu2 }
 0x335   :  { %v1460_v33 = vpop.eup %1459 }
 0x336   :  { %v387_v44 = vpop.xlane.xlu1 %386  ;;  %v398_v45 = vmul.f32 %v1460_v33, %v1456_v12 }
 0x337   :  { %1461 = vrcp.f32 %v387_v44 }
 0x338   :  { %1367 = vmatmul.msk.f32.vlgmr.msrb.gmra.mxu0 %vm94_vm0, %v398_v45 }
 0x33b   :  { %v1866_v36 = vpop.f32.mrf.mxu2 }
 0x33d   :  { %v1462_v46 = vpop.eup %1461 }
 0x33e   :  { %v399_v47 = vmul.f32 %v1462_v46, %v1458_v32 }
 0x340   :  { %1368 = vmatmul.msk.f32.gmra.mxu0 %vm94_vm0, %v399_v47 }
 0x343   :  { %v485_v49 = vpop.f32.mrf.mxu2 }
 0x344   :  { %v486_v50 = vadd.f32 %v485_v49, %v1770_v48  ;;  %v373_v48 = vsub.f32 %v1820_v55, %v369_v38  ;;  %v645_v55 = vsel %vm94_vm0, %v634_v8, -inf }
 0x346   :  { %v497_v20 = vsel %vm94_vm0, %v486_v50, -inf  ;;  %v380_v3 = vmul.f32 1.442695, %v373_v48 }
 0x347   :  { %498 = vmax.xlane.f32.xlu0 %v497_v20 }
 0x34b   :  { %v488_v52 = vpop.f32.mrf.mxu2 }
 0x34c   :  { %v489_v23 = vadd.f32 %v488_v52, %v1774_v54  ;;  %v378_v54 = vmul.f32 1.442695, %v372_v61 }
 0x34e   :  { %v500_v21 = vsel %vm94_vm0, %v489_v23, -inf  ;;  %1463 = vpow2.f32 %v378_v54 }
 0x34f   :  { %501 = vmax.xlane.f32.xlu0 %v500_v21  ;;  %1465 = vpow2.f32 %v380_v3 }
 0x353   :  { %v491_v58 = vpop.f32.mrf.mxu2 }
 0x354   :  { %v492_v62 = vadd.f32 %v491_v58, %v1778_v60  ;;  %v648_v60 = vsub.f32 %v1825_v57, %v638_v39  ;;  %v1884_v16 = vpop.eup %1463 }
 0x355   :  { %v1886_v22 = vpop.eup %1465  ;;  %v388_v28 = vsel %vm94_vm0, %v1884_v16, 0.0 }
 0x356   :  { %v503_v63 = vsel %vm94_vm0, %v492_v62, -inf  ;;  %v652_v13 = vmul.f32 1.442695, %v648_v60 }
 0x357   :  { %504 = vmax.xlane.f32.xlu2 %v503_v63  ;;  %643 = vmax.xlane.f32.xlu0 %v642_v0 }
 0x358   :  { %1467 = vpow2.f32 %v652_v13 }
 0x35b   :  { %v494_v10 = vpop.f32.mrf.mxu2 }
 0x35c   :  { %v495_v11 = vadd.f32 %v494_v10, %v1782_v1  ;;  %v391_v1 = vsel %vm94_vm0, %v1886_v22, 0.0 }
 0x35e   :  { %v506_v51 = vsel %vm94_vm0, %v495_v11, -inf  ;;  %v1892_v57 = vpop.eup %1467 }
 0x35f   :  { %507 = vmax.xlane.f32.xlu2 %v506_v51  ;;  %646 = vmax.xlane.f32.xlu0 %v645_v55  ;;  %v660_v29 = vsel %vm94_vm0, %v1892_v57, 0.0 }
 0x367   :  { %389 = vadd.xlane.f32.xlu2 %v388_v28  ;;  %392 = vadd.xlane.f32.xlu0 %v391_v1 }
 0x36f   :  { %661 = vadd.xlane.f32.xlu2 %v660_v29 }
 0x3ba   :  { %v499_v24 = vpop.xlane.xlu0 %498 }
 0x3bb   :  { %v509_v31 = vsub.f32 %v486_v50, %v499_v24 }
 0x3bd   :  { %v513_v18 = vmul.f32 1.442695, %v509_v31 }
 0x3bf   :  { %1469 = vpow2.f32 %v513_v18 }
 0x3c0   :  { %1471 = vpow2.f32 %v654_v19  ;;  %v43_v19 = vld [vmem:[#allocation2 + $0x38] sm:$0xff] }
 0x3c1   :  { %754 = vmatpush.msra.mxu2 %v43_v19 }
 0x3c2   :  { %v502_v12 = vpop.xlane.xlu0 %501 }
 0x3c3   :  { %v510_v14 = vsub.f32 %v489_v23, %v502_v12 }
 0x3c5   :  { %v1470_v15 = vpop.eup %1469  ;;  %v515_v32 = vmul.f32 1.442695, %v510_v14 }
 0x3c6   :  { %v521_v34 = vsel %vm94_vm0, %v1470_v15, 0.0  ;;  %v1472_v26 = vpop.eup %1471 }
 0x3c7   :  { %1473 = vpow2.f32 %v515_v32  ;;  %522 = vadd.xlane.f32.xlu1 %v521_v34  ;;  %v663_v41 = vsel %vm94_vm0, %v1472_v26, 0.0  ;;  %v41_v32 = vld [vmem:[#allocation2 + $0x28] sm:$0xff]  ;;  %v40_v34 = vld [vmem:[#allocation2 + $0x20] sm:$0xff] }
 0x3ca   :  { %v505_v35 = vpop.xlane.xlu2 %504  ;;  %v644_v37 = vpop.xlane.xlu0 %643 }
 0x3cb   :  { %v511_v38 = vsub.f32 %v492_v62, %v505_v35  ;;  %v650_v39 = vsub.f32 %v631_v27, %v644_v37 }
 0x3cd   :  { %v1474_v42 = vpop.eup %1473  ;;  %v517_v33 = vmul.f32 1.442695, %v511_v38  ;;  %v656_v59 = vmul.f32 1.442695, %v650_v39  ;;  %v431_v39 = vpop.f32.mrf.mxu0 }
 0x3ce   :  { %v524_v44 = vsel %vm94_vm0, %v1474_v42, 0.0 }
 0x3cf   :  { %1475 = vpow2.f32 %v517_v33  ;;  %664 = vadd.xlane.f32.xlu1 %v663_v41  ;;  %525 = vadd.xlane.f32.xlu0 %v524_v44  ;;  %v443_v41 = vsel %vm312_vm2, %v431_v39, 0.0  ;;  %v304_v44 = vsel %vm141_vm1, %v1859_v40, 0.0  ;;  %v305_v40 = vsel %vm141_vm1, %v1861_v30, 0.0 }
 0x3d0   :  { %1477 = vpow2.f32 %v656_v59  ;;  %v306_v30 = vsel %vm141_vm1, %v1863_v43, 0.0  ;;  %v307_v43 = vsel %vm141_vm1, %v1866_v36, 0.0 }
 0x3d2   :  { %v508_v45 = vpop.xlane.xlu2 %507  ;;  %v647_v46 = vpop.xlane.xlu0 %646 }
 0x3d3   :  { %v512_v47 = vsub.f32 %v495_v11, %v508_v45  ;;  %v651_v49 = vsub.f32 %v634_v8, %v647_v46  ;;  %v447_v45 = vadd.f32 %v443_v41, %v304_v44 }
 0x3d5   :  { %v1476_v50 = vpop.eup %1475  ;;  %v519_v20 = vmul.f32 1.442695, %v512_v47  ;;  %v658_v52 = vmul.f32 1.442695, %v651_v49 }
 0x3d6   :  { %v1478_v23 = vpop.eup %1477  ;;  %v527_v53 = vsel %vm94_vm0, %v1476_v50, 0.0 }
 0x3d7   :  { %1479 = vpow2.f32 %v519_v20  ;;  %528 = vadd.xlane.f32.xlu2 %v527_v53  ;;  %v666_v21 = vsel %vm94_vm0, %v1478_v23, 0.0 }
 0x3d8   :  { %1481 = vpow2.f32 %v658_v52  ;;  %667 = vadd.xlane.f32.xlu0 %v666_v21 }
 0x3da   :  { %v390_v56 = vpop.xlane.xlu2 %389  ;;  %v393_v61 = vpop.xlane.xlu0 %392 }
 0x3db   :  { %1483 = vrcp.f32 %v390_v56 }
 0x3dc   :  { %1485 = vrcp.f32 %v393_v61 }
 0x3dd   :  { %v1480_v27 = vpop.eup %1479 }
 0x3de   :  { %v1482_v58 = vpop.eup %1481  ;;  %v530_v62 = vsel %vm94_vm0, %v1480_v27, 0.0 }
 0x3df   :  { %531 = vadd.xlane.f32.xlu1 %v530_v62  ;;  %v669_v48 = vsel %vm94_vm0, %v1482_v58, 0.0 }
 0x3e0   :  { %670 = vadd.xlane.f32.xlu2 %v669_v48 }
 0x3e1   :  { %v1484_v63 = vpop.eup %1483 }
 0x3e2   :  { %v400_v0 = vmul.f32 %v1484_v63, %v1884_v16  ;;  %v662_v2 = vpop.xlane.xlu2 %661  ;;  %v1486_v54 = vpop.eup %1485 }
 0x3e3   :  { %1487 = vrcp.f32 %v662_v2  ;;  %v401_v3 = vmul.f32 %v1486_v54, %v1886_v22 }
 0x3e4   :  { %1369 = vmatmul.msk.f32.gmra.mxu0 %vm94_vm0, %v400_v0 }
 0x3e9   :  { %v1488_v8 = vpop.eup %1487 }
 0x3ea   :  { %v676_v10 = vmul.f32 %v1488_v8, %v1892_v57 }
 0x3ec   :  { %1370 = vmatmul.msk.f32.gmra.mxu0 %vm94_vm0, %v401_v3 }
 0x3f4   :  { %1391 = vmatmul.msk.f32.vlgmr.msra.gmra.mxu0 %vm94_vm0, %v676_v10 }
 0x43a   :  { %v523_v11 = vpop.xlane.xlu1 %522 }
 0x43b   :  { %1489 = vrcp.f32 %v523_v11 }
 0x441   :  { %v1490_v60 = vpop.eup %1489 }
 0x442   :  { %v665_v51 = vpop.xlane.xlu1 %664  ;;  %v526_v55 = vpop.xlane.xlu0 %525  ;;  %v537_v13 = vmul.f32 %v1490_v60, %v1470_v15  ;;  %v42_v15 = vld [vmem:[#allocation2 + $0x30] sm:$0xff] }
 0x443   :  { %1491 = vrcp.f32 %v665_v51  ;;  %755 = vmatpush.msra.mxu2 %v42_v15 }
 0x444   :  { %1493 = vrcp.f32 %v526_v55  ;;  %1379 = vmatmul.msk.f32.vlgmr.msrb.gmra.mxu1 %vm94_vm0, %v537_v13 }
 0x445   :  { %756 = vmatpush.msra.mxu2 %v41_v32 }
 0x447   :  { %757 = vmatpush.msra.mxu2 %v40_v34 }
 0x449   :  { %v1492_v16 = vpop.eup %1491 }
 0x44a   :  { %v1494_v28 = vpop.eup %1493  ;;  %v529_v22 = vpop.xlane.xlu2 %528  ;;  %v677_v1 = vmul.f32 %v1492_v16, %v1472_v26 }
 0x44b   :  { %1495 = vrcp.f32 %v529_v22  ;;  %v668_v29 = vpop.xlane.xlu0 %667  ;;  %v538_v24 = vmul.f32 %v1494_v28, %v1474_v42  ;;  %v434_v42 = vpop.f32.mrf.mxu0 }
 0x44c   :  { %1497 = vrcp.f32 %v668_v29  ;;  %1392 = vmatmul.msk.f32.gmra.mxu0 %vm94_vm0, %v677_v1  ;;  %v729_v1 = vperm.slane %v1651_v9, 1 }
 0x44d   :  { %1380 = vmatmul.msk.f32.gmra.mxu1 %vm94_vm0, %v538_v24 }
 0x451   :  { %v1496_v57 = vpop.eup %1495 }
 0x452   :  { %v1498_v31 = vpop.eup %1497  ;;  %v532_v17 = vpop.xlane.xlu1 %531  ;;  %v539_v18 = vmul.f32 %v1496_v57, %v1476_v50 }
 0x453   :  { %1499 = vrcp.f32 %v532_v17  ;;  %v671_v12 = vpop.xlane.xlu2 %670  ;;  %v678_v14 = vmul.f32 %v1498_v31, %v1478_v23  ;;  %v444_v23 = vsel %vm312_vm2, %v434_v42, 0.0 }
 0x454   :  { %1501 = vrcp.f32 %v671_v12  ;;  %v448_v21 = vadd.f32 %v444_v23, %v305_v40 }
 0x455   :  { %1381 = vmatmul.msk.f32.gmra.mxu1 %vm94_vm0, %v539_v18  ;;  %1393 = vmatmul.msk.f32.gmra.mxu0 %vm94_vm0, %v678_v14 }
 0x459   :  { %v1500_v35 = vpop.eup %1499 }
 0x45a   :  { %v1502_v37 = vpop.eup %1501  ;;  %v540_v26 = vmul.f32 %v1500_v35, %v1480_v27  ;;  %v1597_v35 = vmov 32.0  }
 0x45b   :  { %v679_v38 = vmul.f32 %v1502_v37, %v1482_v58  ;;  %1503 = vrcp.f32 %v1597_v35 }
 0x45d   :  { %1382 = vmatmul.msk.f32.gmra.mxu1 %vm94_vm0, %v540_v26  ;;  %1394 = vmatmul.msk.f32.gmra.mxu0 %vm94_vm0, %v679_v38 }
 0x461   :  { %v437_v33 = vpop.f32.mrf.mxu0 }
 0x462   :  { %v445_v48 = vsel %vm312_vm2, %v437_v33, 0.0 }
 0x463   :  { %v449_v63 = vadd.f32 %v445_v48, %v306_v30  ;;  %v53_v48 = vld [vmem:[#allocation2 + $0x88] sm:$0xff]  ;;  %v52_v30 = vld [vmem:[#allocation2 + $0x80] sm:$0xff] }
 0x469   :  { %v440_v59 = vpop.f32.mrf.mxu0 }
 0x46a   :  { %v446_v11 = vsel %vm312_vm2, %v440_v59, 0.0  ;;  %v55_v59 = vld [vmem:[#allocation2 + $0x98] sm:$0xff] }
 0x46b   :  { %v450_v60 = vadd.f32 %v446_v11, %v307_v43  ;;  %905 = vmatpush.msra.mxu1 %v55_v59 }
 0x471   :  { %v709_v46 = vpop.f32.mrf.mxu0 }
 0x472   :  { %v721_v20 = vsel %vm590_vm3, %v709_v46, 0.0 }
 0x4c1   :  { %v570_v47 = vpop.f32.mrf.mxu1 }
 0x4c2   :  { %v582_v49 = vsel %vm451_vm8, %v570_v47, 0.0 }
 0x4c3   :  { %v586_v50 = vadd.f32 %v582_v49, %v447_v45 }
 0x4c5   :  { %v725_v52 = vadd.f32 %v721_v20, %v586_v50 }
 0x4c7   :  { %1395 = vmatmul.msk.f32.vlgmr.msra.gmra.mxu2 %vm94_vm0, %v725_v52 }
 0x4c9   :  { %v712_v53 = vpop.f32.mrf.mxu0 }
 0x4ca   :  { %v573_v56 = vpop.f32.mrf.mxu1  ;;  %v722_v61 = vsel %vm590_vm3, %v712_v53, 0.0 }
 0x4cb   :  { %v583_v27 = vsel %vm451_vm8, %v573_v56, 0.0 }
 0x4cc   :  { %v587_v58 = vadd.f32 %v583_v27, %v448_v21 }
 0x4ce   :  { %v726_v62 = vadd.f32 %v722_v61, %v587_v58 }
 0x4d0   :  { %1396 = vmatmul.msk.f32.gmra.mxu2 %vm94_vm0, %v726_v62  ;;  %v54_v62 = vld [vmem:[#allocation2 + $0x90] sm:$0xff] }
 0x4d1   :  { %906 = vmatpush.msra.mxu1 %v54_v62 }
 0x4d2   :  { %v576_v0 = vpop.f32.mrf.mxu1  ;;  %v715_v2 = vpop.f32.mrf.mxu0 }
 0x4d3   :  { %v584_v54 = vsel %vm451_vm8, %v576_v0, 0.0  ;;  %v723_v8 = vsel %vm590_vm3, %v715_v2, 0.0  ;;  %907 = vmatpush.msra.mxu1 %v53_v48 }
 0x4d4   :  { %v588_v3 = vadd.f32 %v584_v54, %v449_v63 }
 0x4d5   :  { %908 = vmatpush.msra.mxu1 %v52_v30 }
 0x4d6   :  { %v727_v10 = vadd.f32 %v723_v8, %v588_v3 }
 0x4d8   :  { %1397 = vmatmul.msk.f32.gmra.mxu2 %vm94_vm0, %v727_v10 }
 0x4da   :  { %v579_v51 = vpop.f32.mrf.mxu1  ;;  %v718_v55 = vpop.f32.mrf.mxu0 }
 0x4db   :  { %v585_v13 = vsel %vm451_vm8, %v579_v51, 0.0  ;;  %v724_v28 = vsel %vm590_vm3, %v718_v55, 0.0 }
 0x4dc   :  { %v589_v16 = vadd.f32 %v585_v13, %v450_v60 }
 0x4de   :  { %v728_v22 = vadd.f32 %v724_v28, %v589_v16 }
 0x4e0   :  { %1398 = vmatmul.msk.f32.gmra.mxu2 %vm94_vm0, %v728_v22 }
 0x54a   :  { %v759_v29 = vpop.f32.mrf.mxu2 }
 0x54b   :  { %v760_v24 = vadd.f32 %v759_v29, %v729_v1 }
 0x54d   :  { %v771_v57 = vadd.f32 %v760_v24, %v1626_v4 }
 0x54f   :  { %v775_v36 = vsel %vm94_vm0, %v771_v57, 0.0 }
 0x550   :  { %776 = vadd.xlane.f32.xlu0 %v775_v36  ;;  %v67_v36 = vld [vmem:[#allocation2 + $0xf8] sm:$0xff] }
 0x551   :  { %948 = vmatpush.msrb.mxu3 %v67_v36 }
 0x553   :  { %v762_v31 = vpop.f32.mrf.mxu2 }
 0x554   :  { %v763_v17 = vadd.f32 %v762_v31, %v729_v1  ;;  %v66_v31 = vld [vmem:[#allocation2 + $0xf0] sm:$0xff] }
 0x555   :  { %949 = vmatpush.msrb.mxu3 %v66_v31 }
 0x556   :  { %v772_v18 = vadd.f32 %v763_v17, %v1640_v6  ;;  %v1504_v6 = vpop.eup %1503 }
 0x557   :  { %v788_v37 = vmul.f32 32.0, %v1504_v6  ;;  %vm792_vm9 = vweird.f32 %v1504_v6 }
 0x558   :  { %v778_v19 = vsel %vm94_vm0, %v772_v18, 0.0 }
 0x559   :  { %779 = vadd.xlane.f32.xlu1 %v778_v19  ;;  %v789_v26 = vsub.f32 1.0, %v788_v37  ;;  %v63_v37 = vld [vmem:[#allocation2 + $0xd8] sm:$0xff] }
 0x55b   :  { %v765_v25 = vpop.f32.mrf.mxu2  ;;  %v790_v38 = vmul.f32 %v1504_v6, %v789_v26 }
 0x55c   :  { %v766_v12 = vadd.f32 %v765_v25, %v729_v1  ;;  %v65_v25 = vld [vmem:[#allocation2 + $0xe8] sm:$0xff] }
 0x55d   :  { %v791_v39 = vadd.f32 %v1504_v6, %v790_v38  ;;  %950 = vmatpush.msrb.mxu3 %v65_v25 }
 0x55e   :  { %v773_v14 = vadd.f32 %v766_v12, %v1631_v5 }
 0x55f   :  { %v1966_v42 = vsel %vm792_vm9, %v1504_v6, %v791_v39  ;;  %v62_v39 = vld [vmem:[#allocation2 + $0xd0] sm:$0xff] }
 0x560   :  { %v781_v9 = vsel %vm94_vm0, %v773_v14, 0.0 }
 0x561   :  { %782 = vadd.xlane.f32.xlu2 %v781_v9 }
 0x563   :  { %v768_v15 = vpop.f32.mrf.mxu2 }
 0x564   :  { %v769_v32 = vadd.f32 %v768_v15, %v729_v1  ;;  %v1991_v1 = vld [vmem:[#allocation2 + $0x100] sm:$0xff] }
 0x565   :  { %v1994_v29 = vperm.slane %v1991_v1, 2  ;;  %v875_v19 = vperm.slane %v1991_v1, 3 }
 0x566   :  { %v774_v4 = vadd.f32 %v769_v32, %v1645_v7  ;;  %v64_v32 = vld [vmem:[#allocation2 + $0xe0] sm:$0xff] }
 0x567   :  { %951 = vmatpush.msrb.mxu3 %v64_v32 }
 0x568   :  { %v784_v34 = vsel %vm94_vm0, %v774_v4, 0.0 }
 0x569   :  { %785 = vadd.xlane.f32.xlu0 %v784_v34  ;;  %952 = vmatpush.msrb.mxu3 %v63_v37 }
 0x56b   :  { %953 = vmatpush.msrb.mxu3 %v62_v39 }
 0x5c3   :  { %v777_v5 = vpop.xlane.xlu0 %776 }
 0x5c4   :  { %v794_v33 = vmul.f32 %v1966_v42, %v777_v5 }
 0x5c6   :  { %v798_v41 = vsub.f32 %v771_v57, %v794_v33 }
 0x5c8   :  { %v802_v7 = vmul.f32 %v798_v41, %v798_v41 }
 0x5ca   :  { %v806_v44 = vsel %vm94_vm0, %v802_v7, 0.0 }
 0x5cb   :  { %807 = vadd.xlane.f32.xlu1 %v806_v44 }
 0x5cc   :  { %v780_v45 = vpop.xlane.xlu1 %779 }
 0x5cd   :  { %v795_v46 = vmul.f32 %v1966_v42, %v780_v45 }
 0x5cf   :  { %v1971_v47 = vsub.f32 %v772_v18, %v795_v46 }
 0x5d1   :  { %v803_v49 = vmul.f32 %v1971_v47, %v1971_v47 }
 0x5d3   :  { %v809_v50 = vsel %vm94_vm0, %v803_v49, 0.0 }
 0x5d4   :  { %810 = vadd.xlane.f32.xlu2 %v809_v50  ;;  %v783_v20 = vpop.xlane.xlu2 %782 }
 0x5d5   :  { %v796_v52 = vmul.f32 %v1966_v42, %v783_v20 }
 0x5d7   :  { %v1977_v23 = vsub.f32 %v773_v14, %v796_v52 }
 0x5d9   :  { %v804_v40 = vmul.f32 %v1977_v23, %v1977_v23 }
 0x5db   :  { %v812_v53 = vsel %vm94_vm0, %v804_v40, 0.0 }
 0x5dc   :  { %813 = vadd.xlane.f32.xlu0 %v812_v53  ;;  %v786_v21 = vpop.xlane.xlu0 %785 }
 0x5dd   :  { %v797_v56 = vmul.f32 %v1966_v42, %v786_v21 }
 0x5df   :  { %v1983_v27 = vsub.f32 %v774_v4, %v797_v56 }
 0x5e1   :  { %v805_v58 = vmul.f32 %v1983_v27, %v1983_v27 }
 0x5e3   :  { %v815_v61 = vsel %vm94_vm0, %v805_v58, 0.0 }
 0x5e4   :  { %816 = vadd.xlane.f32.xlu1 %v815_v61 }
 0x63e   :  { %v808_v63 = vpop.xlane.xlu1 %807 }
 0x63f   :  { %v818_v0 = vmul.f32 %v808_v63, %v1966_v42 }
 0x641   :  { %v822_v2 = vadd.f32 1e-05, %v818_v0  ;;  %v880_v0 = vperm.slane %v1991_v1, 4 }
 0x643   :  { %1505 = vrsqrt.f32 %v822_v2  ;;  %vm832_vm11 = vweird.f32 %v822_v2 }
 0x647   :  { %v811_v54 = vpop.xlane.xlu2 %810 }
 0x648   :  { %v819_v3 = vmul.f32 %v811_v54, %v1966_v42 }
 0x649   :  { %v1506_v8 = vpop.eup %1505 }
 0x64a   :  { %v827_v10 = vmul.f32 %v1506_v8, %v822_v2  ;;  %v823_v11 = vadd.f32 1e-05, %v819_v3  ;;  %vm833_vm10 = vweird.f32 %v1506_v8 }
 0x64b   :  { %vm834_vm12 = vmor %vm832_vm11, %vm833_vm10 }
 0x64c   :  { %v828_v43 = vmul.f32 %v1506_v8, %v827_v10  ;;  %1507 = vrsqrt.f32 %v823_v11  ;;  %vm842_vm14 = vweird.f32 %v823_v11 }
 0x64e   :  { %v829_v60 = vmul.f32 0.5, %v828_v43 }
 0x64f   :  { %v814_v51 = vpop.xlane.xlu0 %813 }
 0x650   :  { %v830_v55 = vsub.f32 1.5, %v829_v60  ;;  %v820_v13 = vmul.f32 %v814_v51, %v1966_v42 }
 0x652   :  { %v1508_v16 = vpop.eup %1507  ;;  %v831_v28 = vmul.f32 %v1506_v8, %v830_v55  ;;  %v824_v22 = vadd.f32 1e-05, %v820_v13 }
 0x653   :  { %v837_v24 = vmul.f32 %v1508_v16, %v823_v11  ;;  %vm843_vm13 = vweird.f32 %v1508_v16 }
 0x654   :  { %v835_v57 = vsel %vm834_vm12, %v1506_v8, %v831_v28  ;;  %1509 = vrsqrt.f32 %v824_v22  ;;  %vm844_vm15 = vmor %vm842_vm14, %vm843_vm13  ;;  %vm852_vm2 = vweird.f32 %v824_v22 }
 0x655   :  { %v866_v17 = vmul.f32 %v835_v57, %v798_v41  ;;  %v838_v18 = vmul.f32 %v1508_v16, %v837_v24  ;;  %v61_v41 = vld [vmem:[#allocation2 + $0xc8] sm:$0xff] }
 0x656   :  { %954 = vmatpush.msrb.mxu3 %v61_v41 }
 0x657   :  { %v871_v12 = vmul.f32 %v1994_v29, %v866_v17  ;;  %v839_v14 = vmul.f32 0.5, %v838_v18  ;;  %v817_v9 = vpop.xlane.xlu1 %816 }
 0x658   :  { %v821_v15 = vmul.f32 %v817_v9, %v1966_v42 }
 0x659   :  { %v840_v4 = vsub.f32 1.5, %v839_v14  ;;  %v1999_v34 = vadd.f32 %v875_v19, %v871_v12 }
 0x65a   :  { %v1510_v35 = vpop.eup %1509  ;;  %v825_v6 = vadd.f32 1e-05, %v821_v15 }
 0x65b   :  { %v841_v26 = vmul.f32 %v1508_v16, %v840_v4  ;;  %v847_v38 = vmul.f32 %v1510_v35, %v824_v22  ;;  %1399 = vmatmul.msk.f32.vlgmr.msra.gmra.mxu1 %vm94_vm0, %v1999_v34  ;;  %vm853_vm1 = vweird.f32 %v1510_v35 }
 0x65c   :  { %1511 = vrsqrt.f32 %v825_v6  ;;  %vm854_vm3 = vmor %vm852_vm2, %vm853_vm1  ;;  %vm862_vm5 = vweird.f32 %v825_v6 }
 0x65d   :  { %v845_v5 = vsel %vm844_vm15, %v1508_v16, %v841_v26  ;;  %v848_v33 = vmul.f32 %v1510_v35, %v847_v38  ;;  %v926_v16 = vperm.slane %v1991_v1, 5 }
 0x65e   :  { %v867_v59 = vmul.f32 %v845_v5, %v1971_v47 }
 0x65f   :  { %v849_v7 = vmul.f32 0.5, %v848_v33 }
 0x660   :  { %v872_v44 = vmul.f32 %v1994_v29, %v867_v59 }
 0x661   :  { %v850_v45 = vsub.f32 1.5, %v849_v7 }
 0x662   :  { %v1512_v46 = vpop.eup %1511  ;;  %v877_v49 = vadd.f32 %v875_v19, %v872_v44 }
 0x663   :  { %v851_v50 = vmul.f32 %v1510_v35, %v850_v45  ;;  %v857_v20 = vmul.f32 %v1512_v46, %v825_v6  ;;  %vm863_vm4 = vweird.f32 %v1512_v46 }
 0x664   :  { %1400 = vmatmul.msk.f32.gmra.mxu1 %vm94_vm0, %v877_v49  ;;  %vm864_vm6 = vmor %vm862_vm5, %vm863_vm4  ;;  %vm1138_vm5 = vcmask 269568  }
 0x665   :  { %v855_v52 = vsel %vm854_vm3, %v1510_v35, %v851_v50  ;;  %v858_v40 = vmul.f32 %v1512_v46, %v857_v20  ;;  %v47_v35 = vld [vmem:[#allocation2 + $0x58] sm:$0xff] }
 0x666   :  { %v868_v47 = vmul.f32 %v855_v52, %v1977_v23  ;;  %v60_v23 = vld [vmem:[#allocation2 + $0xc0] sm:$0xff]  ;;  %1096 = vmatpush.msrb.mxu0 %v47_v35 }
 0x667   :  { %v859_v53 = vmul.f32 0.5, %v858_v40  ;;  %955 = vmatpush.msrb.mxu3 %v60_v23 }
 0x668   :  { %v873_v21 = vmul.f32 %v1994_v29, %v868_v47  ;;  %v46_v47 = vld [vmem:[#allocation2 + $0x50] sm:$0xff] }
 0x669   :  { %v860_v56 = vsub.f32 1.5, %v859_v53  ;;  %1097 = vmatpush.msrb.mxu0 %v46_v47  ;;  %v45_v53 = vld [vmem:[#allocation2 + $0x48] sm:$0xff] }
 0x66a   :  { %v878_v58 = vadd.f32 %v875_v19, %v873_v21  ;;  %v44_v21 = vld [vmem:[#allocation2 + $0x40] sm:$0xff] }
 0x66b   :  { %v861_v61 = vmul.f32 %v1512_v46, %v860_v56  ;;  %1098 = vmatpush.msrb.mxu0 %v45_v53 }
 0x66c   :  { %1401 = vmatmul.msk.f32.gmra.mxu1 %vm94_vm0, %v878_v58 }
 0x66d   :  { %v865_v62 = vsel %vm864_vm6, %v1512_v46, %v861_v61  ;;  %1099 = vmatpush.msrb.mxu0 %v44_v21  ;;  %vm1235_vm6 = vcmask 1040384  }
 0x66e   :  { %v869_v48 = vmul.f32 %v865_v62, %v1983_v27 }
 0x670   :  { %v874_v30 = vmul.f32 %v1994_v29, %v869_v48 }
 0x672   :  { %v879_v63 = vadd.f32 %v875_v19, %v874_v30 }
 0x674   :  { %1402 = vmatmul.msk.f32.gmra.mxu1 %vm94_vm0, %v879_v63 }
 0x6d8   :  { %v910_v2 = vpop.f32.mrf.mxu1 }
 0x6d9   :  { %v911_v54 = vadd.f32 %v910_v2, %v880_v0 }
 0x6db   :  { %v922_v3 = vmax.f32 %v911_v54, 0.0 }
 0x6dd   :  { %1403 = vmatmul.msk.f32.vlgmr.msrb.gmra.mxu3 %vm927_vm7, %v922_v3 }
 0x6e1   :  { %v913_v8 = vpop.f32.mrf.mxu1 }
 0x6e2   :  { %v914_v10 = vadd.f32 %v913_v8, %v880_v0 }
 0x6e4   :  { %v923_v11 = vmax.f32 %v914_v10, 0.0 }
 0x6e6   :  { %1404 = vmatmul.msk.f32.gmra.mxu3 %vm927_vm7, %v923_v11 }
 0x6e9   :  { %v916_v43 = vpop.f32.mrf.mxu1 }
 0x6ea   :  { %v917_v27 = vadd.f32 %v916_v43, %v880_v0 }
 0x6ec   :  { %v924_v60 = vmax.f32 %v917_v27, 0.0  ;;  %v1061_v27 = vperm.slane %v1991_v1, 6 }
 0x6ee   :  { %1405 = vmatmul.msk.f32.gmra.mxu3 %vm927_vm7, %v924_v60 }
 0x6f1   :  { %v919_v51 = vpop.f32.mrf.mxu1 }
 0x6f2   :  { %v920_v55 = vadd.f32 %v919_v51, %v880_v0 }
 0x6f4   :  { %v925_v13 = vmax.f32 %v920_v55, 0.0 }
 0x6f6   :  { %1406 = vmatmul.msk.f32.gmra.mxu3 %vm927_vm7, %v925_v13  ;;  %vm1261_vm7 = vcmask 254976  }
 0x760   :  { %v957_v28 = vpop.f32.mrf.mxu3 }
 0x761   :  { %v958_v22 = vadd.f32 %v957_v28, %v926_v16 }
 0x763   :  { %v969_v29 = vadd.f32 %v958_v22, %v1999_v34 }
 0x765   :  { %v973_v24 = vsel %vm94_vm0, %v969_v29, 0.0 }
 0x766   :  { %974 = vadd.xlane.f32.xlu2 %v973_v24 }
 0x769   :  { %v960_v57 = vpop.f32.mrf.mxu3 }
 0x76a   :  { %v961_v36 = vadd.f32 %v960_v57, %v926_v16 }
 0x76c   :  { %v970_v31 = vadd.f32 %v961_v36, %v877_v49 }
 0x76e   :  { %v976_v17 = vsel %vm94_vm0, %v970_v31, 0.0 }
 0x76f   :  { %977 = vadd.xlane.f32.xlu0 %v976_v17 }
 0x771   :  { %v963_v18 = vpop.f32.mrf.mxu3 }
 0x772   :  { %v964_v19 = vadd.f32 %v963_v18, %v926_v16 }
 0x774   :  { %v971_v25 = vadd.f32 %v964_v19, %v878_v58 }
 0x776   :  { %v979_v12 = vsel %vm94_vm0, %v971_v25, 0.0 }
 0x777   :  { %980 = vadd.xlane.f32.xlu1 %v979_v12 }
 0x779   :  { %v966_v14 = vpop.f32.mrf.mxu3 }
 0x77a   :  { %v967_v9 = vadd.f32 %v966_v14, %v926_v16  ;;  %v1066_v16 = vperm.slane %v1991_v1, 7 }
 0x77c   :  { %v972_v15 = vadd.f32 %v967_v9, %v879_v63 }
 0x77e   :  { %v982_v32 = vsel %vm94_vm0, %v972_v15, 0.0 }
 0x77f   :  { %983 = vadd.xlane.f32.xlu2 %v982_v32 }
 0x7d9   :  { %v975_v4 = vpop.xlane.xlu2 %974 }
 0x7da   :  { %v985_v34 = vmul.f32 %v975_v4, %v1966_v42 }
 0x7dc   :  { %v989_v6 = vsub.f32 %v969_v29, %v985_v34 }
 0x7de   :  { %v993_v37 = vmul.f32 %v989_v6, %v989_v6 }
 0x7e0   :  { %v997_v26 = vsel %vm94_vm0, %v993_v37, 0.0 }
 0x7e1   :  { %998 = vadd.xlane.f32.xlu0 %v997_v26 }
 0x7e2   :  { %v978_v38 = vpop.xlane.xlu0 %977 }
 0x7e3   :  { %v986_v39 = vmul.f32 %v978_v38, %v1966_v42 }
 0x7e5   :  { %v2022_v5 = vsub.f32 %v970_v31, %v986_v39 }
 0x7e7   :  { %v994_v33 = vmul.f32 %v2022_v5, %v2022_v5 }
 0x7e9   :  { %v1000_v59 = vsel %vm94_vm0, %v994_v33, 0.0 }
 0x7ea   :  { %v981_v41 = vpop.xlane.xlu1 %980  ;;  %1001 = vadd.xlane.f32.xlu1 %v1000_v59 }
 0x7eb   :  { %v987_v7 = vmul.f32 %v981_v41, %v1966_v42 }
 0x7ed   :  { %v2028_v44 = vsub.f32 %v971_v25, %v987_v7 }
 0x7ef   :  { %v995_v45 = vmul.f32 %v2028_v44, %v2028_v44 }
 0x7f1   :  { %v1003_v46 = vsel %vm94_vm0, %v995_v45, 0.0 }
 0x7f2   :  { %v984_v49 = vpop.xlane.xlu2 %983  ;;  %1004 = vadd.xlane.f32.xlu2 %v1003_v46 }
 0x7f3   :  { %v988_v50 = vmul.f32 %v984_v49, %v1966_v42 }
 0x7f5   :  { %v2034_v20 = vsub.f32 %v972_v15, %v988_v50 }
 0x7f7   :  { %v996_v52 = vmul.f32 %v2034_v20, %v2034_v20 }
 0x7f9   :  { %v1006_v40 = vsel %vm94_vm0, %v996_v52, 0.0 }
 0x7fa   :  { %1007 = vadd.xlane.f32.xlu0 %v1006_v40 }
 0x854   :  { %v999_v56 = vpop.xlane.xlu0 %998 }
 0x855   :  { %v1009_v58 = vmul.f32 %v999_v56, %v1966_v42 }
 0x857   :  { %v1013_v61 = vadd.f32 1e-05, %v1009_v58 }
 0x859   :  { %1513 = vrsqrt.f32 %v1013_v61  ;;  %vm1023_vm9 = vweird.f32 %v1013_v61 }
 0x85d   :  { %v1002_v62 = vpop.xlane.xlu1 %1001 }
 0x85e   :  { %v1010_v48 = vmul.f32 %v1002_v62, %v1966_v42 }
 0x85f   :  { %v1514_v30 = vpop.eup %1513 }
 0x860   :  { %v1018_v63 = vmul.f32 %v1514_v30, %v1013_v61  ;;  %v1014_v23 = vadd.f32 1e-05, %v1010_v48  ;;  %vm1024_vm8 = vweird.f32 %v1514_v30 }
 0x861   :  { %vm1025_vm10 = vmor %vm1023_vm9, %vm1024_vm8 }
 0x862   :  { %v1019_v0 = vmul.f32 %v1514_v30, %v1018_v63  ;;  %1515 = vrsqrt.f32 %v1014_v23  ;;  %vm1033_vm12 = vweird.f32 %v1014_v23 }
 0x864   :  { %v1020_v2 = vmul.f32 0.5, %v1019_v0 }
 0x865   :  { %v1005_v54 = vpop.xlane.xlu2 %1004 }
 0x866   :  { %v1021_v3 = vsub.f32 1.5, %v1020_v2  ;;  %v1011_v8 = vmul.f32 %v1005_v54, %v1966_v42 }
 0x868   :  { %v1516_v10 = vpop.eup %1515  ;;  %v1022_v11 = vmul.f32 %v1514_v30, %v1021_v3  ;;  %v1015_v43 = vadd.f32 1e-05, %v1011_v8 }
 0x869   :  { %v1028_v60 = vmul.f32 %v1516_v10, %v1014_v23  ;;  %vm1034_vm11 = vweird.f32 %v1516_v10 }
 0x86a   :  { %v1026_v51 = vsel %vm1025_vm10, %v1514_v30, %v1022_v11  ;;  %1517 = vrsqrt.f32 %v1015_v43  ;;  %vm1035_vm13 = vmor %vm1033_vm12, %vm1034_vm11  ;;  %vm1043_vm15 = vweird.f32 %v1015_v43  ;;  %vm1312_vm11 = vcmask 1041408  }
 0x86b   :  { %v1057_v55 = vmul.f32 %v1026_v51, %v989_v6  ;;  %v1029_v13 = vmul.f32 %v1516_v10, %v1028_v60 }
 0x86d   :  { %v1062_v28 = vmul.f32 %v1061_v27, %v1057_v55  ;;  %v1030_v22 = vmul.f32 0.5, %v1029_v13  ;;  %v1008_v29 = vpop.xlane.xlu0 %1007 }
 0x86e   :  { %v1012_v24 = vmul.f32 %v1008_v29, %v1966_v42 }
 0x86f   :  { %v1031_v57 = vsub.f32 1.5, %v1030_v22  ;;  %v2045_v36 = vadd.f32 %v1066_v16, %v1062_v28 }
 0x870   :  { %v1518_v31 = vpop.eup %1517  ;;  %v1016_v17 = vadd.f32 1e-05, %v1012_v24 }
 0x871   :  { %v1032_v18 = vmul.f32 %v1516_v10, %v1031_v57  ;;  %v1038_v19 = vmul.f32 %v1518_v31, %v1015_v43  ;;  %1407 = vmatmul.msk.f32.vlgmr.msrb.gmra.mxu0 %vm94_vm0, %v2045_v36  ;;  %vm1044_vm14 = vweird.f32 %v1518_v31 }
 0x872   :  { %1519 = vrsqrt.f32 %v1016_v17  ;;  %vm1045_vm1 = vmor %vm1043_vm15, %vm1044_vm14  ;;  %vm1053_vm3 = vweird.f32 %v1016_v17 }
 0x873   :  { %v1036_v1 = vsel %vm1035_vm13, %v1516_v10, %v1032_v18  ;;  %v1039_v25 = vmul.f32 %v1518_v31, %v1038_v19 }
 0x874   :  { %v1058_v12 = vmul.f32 %v1036_v1, %v2022_v5 }
 0x875   :  { %v1040_v14 = vmul.f32 0.5, %v1039_v25 }
 0x876   :  { %v1063_v9 = vmul.f32 %v1061_v27, %v1058_v12 }
 0x877   :  { %v1041_v15 = vsub.f32 1.5, %v1040_v14 }
 0x878   :  { %v1520_v32 = vpop.eup %1519  ;;  %v2050_v4 = vadd.f32 %v1066_v16, %v1063_v9 }
 0x879   :  { %v1042_v34 = vmul.f32 %v1518_v31, %v1041_v15  ;;  %v1048_v35 = vmul.f32 %v1520_v32, %v1016_v17  ;;  %vm1054_vm2 = vweird.f32 %v1520_v32 }
 0x87a   :  { %1408 = vmatmul.msk.f32.gmra.mxu0 %vm94_vm0, %v2050_v4  ;;  %vm1055_vm4 = vmor %vm1053_vm3, %vm1054_vm2 }
 0x87b   :  { %v1046_v6 = vsel %vm1045_vm1, %v1518_v31, %v1042_v34  ;;  %v1049_v37 = vmul.f32 %v1520_v32, %v1048_v35  ;;  %v1598_v34 = vmov 32  }
 0x87c   :  { %v1059_v26 = vmul.f32 %v1046_v6, %v2028_v44  ;;  %v2064_v44 = vld [vmem:[#allocation2 + $0x108] sm:$0xff]  ;;  %1436 = vset.pattern.permute.xlu0 %v1598_v34  ;;  %1435 = vset.pattern.permute.xlu2 %v1598_v34 }
 0x87d   :  { %v1050_v38 = vmul.f32 0.5, %v1049_v37  ;;  %v1071_v49 = vperm.slane %v2064_v44, 0  ;;  %v1117_v40 = vperm.slane %v2064_v44, 1  ;;  %1437 = vset.pattern.permute.xlu1 %v1598_v34 }
 0x87e   :  { %v1064_v39 = vmul.f32 %v1061_v27, %v1059_v26 }
 0x87f   :  { %v1051_v5 = vsub.f32 1.5, %v1050_v38 }
 0x880   :  { %v2055_v33 = vadd.f32 %v1066_v16, %v1064_v39 }
 0x881   :  { %v1052_v59 = vmul.f32 %v1520_v32, %v1051_v5 }
 0x882   :  { %1409 = vmatmul.msk.f32.gmra.mxu0 %vm94_vm0, %v2055_v33 }
 0x883   :  { %v1056_v41 = vsel %vm1055_vm4, %v1520_v32, %v1052_v59 }
 0x884   :  { %v1060_v7 = vmul.f32 %v1056_v41, %v2034_v20 }
 0x886   :  { %v1065_v45 = vmul.f32 %v1061_v27, %v1060_v7 }
 0x888   :  { %v2060_v46 = vadd.f32 %v1066_v16, %v1065_v45 }
 0x88a   :  { %1410 = vmatmul.msk.f32.gmra.mxu0 %vm94_vm0, %v2060_v46 }
 0x8ee   :  { %v1101_v50 = vpop.f32.mrf.mxu0 }
 0x8ef   :  { %v1102_v52 = vadd.f32 %v1101_v50, %v1071_v49 }
 0x8f1   :  { %v1113_v47 = vmax.f32 %v1102_v52, 0.0 }
 0x8f3   :  { %v1118_v53 = vmul.f32 %v1117_v40, %v1113_v47 }
 0x8f5   :  { %v1122_v21 = vsel %vm94_vm0, %v1118_v53, 0.0 }
 0x8f6   :  { %1123 = vadd.xlane.f32.xlu1 %v1122_v21 }
 0x8f7   :  { %v1104_v20 = vpop.f32.mrf.mxu0 }
 0x8f8   :  { %v1105_v56 = vadd.f32 %v1104_v20, %v1071_v49 }
 0x8fa   :  { %v1114_v58 = vmax.f32 %v1105_v56, 0.0 }
 0x8fc   :  { %v1119_v61 = vmul.f32 %v1117_v40, %v1114_v58 }
 0x8fe   :  { %v1125_v62 = vsel %vm94_vm0, %v1119_v61, 0.0 }
 0x8ff   :  { %v1107_v48 = vpop.f32.mrf.mxu0  ;;  %1126 = vadd.xlane.f32.xlu2 %v1125_v62 }
 0x900   :  { %v1108_v30 = vadd.f32 %v1107_v48, %v1071_v49 }
 0x902   :  { %v1115_v63 = vmax.f32 %v1108_v30, 0.0 }
 0x904   :  { %v1120_v23 = vmul.f32 %v1117_v40, %v1115_v63 }
 0x906   :  { %v1128_v0 = vsel %vm94_vm0, %v1120_v23, 0.0 }
 0x907   :  { %1129 = vadd.xlane.f32.xlu0 %v1128_v0  ;;  %v1110_v2 = vpop.f32.mrf.mxu0 }
 0x908   :  { %v1111_v54 = vadd.f32 %v1110_v2, %v1071_v49 }
 0x90a   :  { %v1116_v3 = vmax.f32 %v1111_v54, 0.0 }
 0x90c   :  { %v1121_v8 = vmul.f32 %v1117_v40, %v1116_v3 }
 0x90e   :  { %v1131_v10 = vsel %vm94_vm0, %v1121_v8, 0.0 }
 0x90f   :  { %1132 = vadd.xlane.f32.xlu1 %v1131_v10 }
 0x969   :  { %v1124_v11 = vpop.xlane.xlu1 %1123 }
 0x96a   :  { %v1134_v43 = vadd.f32 %v1124_v11, %v1117_v40 }
 0x96c   :  { %v1139_v51 = vsel %vm1138_vm5, %v1134_v43, -inf }
 0x972   :  { %v1127_v27 = vpop.xlane.xlu2 %1126 }
 0x973   :  { %v1135_v60 = vadd.f32 %v1127_v27, %v1117_v40 }
 0x975   :  { %v1140_v55 = vsel %vm1138_vm5, %v1135_v60, -inf }
 0x976   :  { %v1141_v13 = vmax.f32 %v1139_v51, %v1140_v55  ;;  %v51_v55 = vld [vmem:[#allocation2 + $0x78] sm:$0xff] }
 0x977   :  { %1253 = vmatpush.msrb.mxu2 %v51_v55 }
 0x978   :  { %v1142_v16 = vrot.slane %v1141_v13, 4 }
 0x97a   :  { %v1143_v28 = vmax.f32 %v1141_v13, %v1142_v16  ;;  %v1130_v24 = vpop.xlane.xlu0 %1129  ;;  %v50_v13 = vld [vmem:[#allocation2 + $0x70] sm:$0xff]  ;;  %v49_v16 = vld [vmem:[#allocation2 + $0x68] sm:$0xff] }
 0x97b   :  { %v1136_v31 = vadd.f32 %v1130_v24, %v1117_v40  ;;  %1254 = vmatpush.msrb.mxu2 %v50_v13 }
 0x97c   :  { %v1144_v22 = vrot.slane %v1143_v28, 2 }
 0x97d   :  { %v1187_v12 = vsel %vm1138_vm5, %v1136_v31, -inf  ;;  %1255 = vmatpush.msrb.mxu2 %v49_v16 }
 0x97e   :  { %v1145_v29 = vmax.f32 %v1143_v28, %v1144_v22 }
 0x980   :  { %v1146_v57 = vrot.slane %v1145_v29, 1 }
 0x982   :  { %v1147_v17 = vmax.f32 %v1145_v29, %v1146_v57  ;;  %v1133_v18 = vpop.xlane.xlu1 %1132  ;;  %v48_v29 = vld [vmem:[#allocation2 + $0x60] sm:$0xff] }
 0x983   :  { %v1137_v19 = vadd.f32 %v1133_v18, %v1117_v40  ;;  %1256 = vmatpush.msrb.mxu2 %v48_v29 }
 0x984   :  { %v1148_v1 = vsub.f32 %v1134_v43, %v1147_v17  ;;  %v1149_v25 = vsub.f32 %v1135_v60, %v1147_v17 }
 0x985   :  { %v1188_v14 = vsel %vm1138_vm5, %v1137_v19, -inf }
 0x986   :  { %v1150_v9 = vmul.f32 1.442695, %v1148_v1  ;;  %v1152_v15 = vmul.f32 1.442695, %v1149_v25  ;;  %v1189_v32 = vmax.f32 %v1187_v12, %v1188_v14 }
 0x988   :  { %1521 = vpow2.f32 %v1150_v9  ;;  %v1190_v35 = vrot.slane %v1189_v32, 4 }
 0x989   :  { %1523 = vpow2.f32 %v1152_v15 }
 0x98a   :  { %v1191_v6 = vmax.f32 %v1189_v32, %v1190_v35 }
 0x98c   :  { %v1192_v37 = vrot.slane %v1191_v6, 2 }
 0x98e   :  { %v1522_v26 = vpop.eup %1521  ;;  %v1193_v38 = vmax.f32 %v1191_v6, %v1192_v37 }
 0x98f   :  { %v1524_v39 = vpop.eup %1523  ;;  %v1154_v5 = vsel %vm1138_vm5, %v1522_v26, 0.0 }
 0x990   :  { %v1155_v59 = vsel %vm1138_vm5, %v1524_v39, 0.0  ;;  %v1194_v41 = vrot.slane %v1193_v38, 1 }
 0x991   :  { %v1156_v7 = vadd.f32 %v1155_v59, %v1154_v5 }
 0x992   :  { %v1195_v45 = vmax.f32 %v1193_v38, %v1194_v41 }
 0x993   :  { %v1157_v49 = vrot.slane %v1156_v7, 4 }
 0x994   :  { %v1196_v50 = vsub.f32 %v1136_v31, %v1195_v45  ;;  %v1197_v52 = vsub.f32 %v1137_v19, %v1195_v45 }
 0x995   :  { %v1158_v40 = vadd.f32 %v1157_v49, %v1156_v7  ;;  %v59_v49 = vld [vmem:[#allocation2 + $0xb8] sm:$0xff] }
 0x996   :  { %v1198_v47 = vmul.f32 1.442695, %v1196_v50  ;;  %v1200_v53 = vmul.f32 1.442695, %v1197_v52  ;;  %1304 = vmatpush.msrb.mxu1 %v59_v49 }
 0x997   :  { %v1159_v21 = vrot.slane %v1158_v40, 2 }
 0x998   :  { %1525 = vpow2.f32 %v1198_v47 }
 0x999   :  { %1527 = vpow2.f32 %v1200_v53  ;;  %v1160_v20 = vadd.f32 %v1159_v21, %v1158_v40  ;;  %v58_v21 = vld [vmem:[#allocation2 + $0xb0] sm:$0xff] }
 0x99a   :  { %1305 = vmatpush.msrb.mxu1 %v58_v21 }
 0x99b   :  { %v1161_v56 = vrot.slane %v1160_v20, 1 }
 0x99d   :  { %v1162_v58 = vadd.f32 %v1161_v56, %v1160_v20  ;;  %v57_v20 = vld [vmem:[#allocation2 + $0xa8] sm:$0xff]  ;;  %v56_v56 = vld [vmem:[#allocation2 + $0xa0] sm:$0xff] }
 0x99e   :  { %v1526_v61 = vpop.eup %1525  ;;  %1306 = vmatpush.msrb.mxu1 %v57_v20 }
 0x99f   :  { %v1528_v62 = vpop.eup %1527  ;;  %v1202_v48 = vsel %vm1138_vm5, %v1526_v61, 0.0  ;;  %1529 = vrcp.f32 %v1162_v58 }
 0x9a0   :  { %v1203_v30 = vsel %vm1138_vm5, %v1528_v62, 0.0  ;;  %1307 = vmatpush.msrb.mxu1 %v56_v56 }
 0x9a1   :  { %v1204_v63 = vadd.f32 %v1203_v30, %v1202_v48 }
 0x9a3   :  { %v1205_v23 = vrot.slane %v1204_v63, 4 }
 0x9a5   :  { %v1530_v0 = vpop.eup %1529  ;;  %v1206_v2 = vadd.f32 %v1205_v23, %v1204_v63 }
 0x9a6   :  { %v1165_v54 = vmul.f32 %v1530_v0, %v1524_v39  ;;  %v1164_v3 = vmul.f32 %v1530_v0, %v1522_v26 }
 0x9a7   :  { %v1207_v8 = vrot.slane %v1206_v2, 2 }
 0x9a8   :  { %1173 = vperm.xlu0 %1436, %v1165_v54   ;;  %1168 = vperm.xlu2 %1435, %v1164_v3   ;;  %v1284_v54 = vperm.slane %v2064_v44, 3 }
 0x9a9   :  { %v1208_v10 = vadd.f32 %v1207_v8, %v1206_v2 }
 0x9ab   :  { %v1209_v11 = vrot.slane %v1208_v10, 1 }
 0x9ad   :  { %v1210_v43 = vadd.f32 %v1209_v11, %v1208_v10  ;;  %v1286_v10 = vperm.slane %v2064_v44, 4 }
 0x9af   :  { %1531 = vrcp.f32 %v1210_v43 }
 0x9b5   :  { %v1532_v27 = vpop.eup %1531 }
 0x9b6   :  { %v1213_v60 = vmul.f32 %v1532_v27, %v1528_v62  ;;  %v1212_v51 = vmul.f32 %v1532_v27, %v1526_v61 }
 0x9b8   :  { %1221 = vperm.xlu2 %1435, %v1213_v60   ;;  %1216 = vperm.xlu1 %1437, %v1212_v51  }
 0xa02   :  { %v1169_v28 = vpop.permute.xlu2 %1168 }
 0xa03   :  { %v1176_v57 = vmul.f32 %v1169_v28, %v2045_v36 }
 0xa05   :  { %v1178_v17 = vsel %vm94_vm0, %v1176_v57, 0.0 }
 0xa12   :  { %v1222_v19 = vpop.permute.xlu2 %1221 }
 0xa13   :  { %v1225_v25 = vmul.f32 %v1222_v19, %v2060_v46 }
 0xa15   :  { %v1227_v15 = vsel %vm94_vm0, %v1225_v25, 0.0 }
 0xa1a   :  { %v1174_v22 = vpop.permute.xlu0 %1173 }
 0xa1b   :  { %v1177_v24 = vmul.f32 %v1174_v22, %v2050_v4 }
 0xa1d   :  { %v1179_v31 = vsel %vm94_vm0, %v1177_v24, 0.0 }
 0xa1e   :  { %v1180_v18 = vadd.f32 %v1179_v31, %v1178_v17 }
 0xa20   :  { %v1181_v1 = vrot.slane %v1180_v18, 4 }
 0xa22   :  { %v1182_v12 = vadd.f32 %v1181_v1, %v1180_v18 }
 0xa24   :  { %v1183_v32 = vrot.slane %v1182_v12, 2 }
 0xa26   :  { %v1184_v35 = vadd.f32 %v1183_v32, %v1182_v12 }
 0xa28   :  { %v1185_v26 = vrot.slane %v1184_v35, 1 }
 0xa2a   :  { %v1217_v14 = vpop.permute.xlu1 %1216  ;;  %v1186_v5 = vadd.f32 %v1185_v26, %v1184_v35 }
 0xa2b   :  { %v1224_v9 = vmul.f32 %v1217_v14, %v2055_v33  ;;  %v1237_v33 = vperm.slane %v2064_v44, 2 }
 0xa2d   :  { %v1226_v4 = vsel %vm94_vm0, %v1224_v9, 0.0 }
 0xa2e   :  { %v1228_v34 = vadd.f32 %v1227_v15, %v1226_v4 }
 0xa30   :  { %v1229_v36 = vrot.slane %v1228_v34, 4 }
 0xa32   :  { %v1230_v6 = vadd.f32 %v1229_v36, %v1228_v34 }
 0xa34   :  { %v1231_v37 = vrot.slane %v1230_v6, 2 }
 0xa36   :  { %v1232_v38 = vadd.f32 %v1231_v37, %v1230_v6 }
 0xa38   :  { %v1233_v39 = vrot.slane %v1232_v38, 1 }
 0xa3a   :  { %v1234_v46 = vadd.f32 %v1233_v39, %v1232_v38 }
 0xa3c   :  { %v1236_v59 = vsel %vm1235_vm6, %v1186_v5, %v1234_v46 }
 0xa3d   :  { %1411 = vmatmul.msk.f32.vlgmr.msrb.gmra.mxu2 %vm94_vm0, %v1236_v59 }
 0xac0   :  { %v1258_v41 = vpop.f32.mrf.mxu2 }
 0xac1   :  { %v1259_v7 = vadd.f32 %v1258_v41, %v1237_v33 }
 0xac3   :  { %v1262_v45 = vsel %vm1261_vm7, %v1259_v7, 0.0 }
 0xac4   :  { %1263 = vadd.xlane.f32.xlu1 %v1262_v45 }
 0xb37   :  { %v1264_v50 = vpop.xlane.xlu1 %1263 }
 0xb38   :  { %v1265_v52 = vmul.f32 %v1264_v50, %v1966_v42 }
 0xb3a   :  { %v1266_v40 = vsub.f32 %v1259_v7, %v1265_v52 }
 0xb3c   :  { %v1267_v47 = vmul.f32 %v1266_v40, %v1266_v40 }
 0xb3e   :  { %v1268_v53 = vsel %vm1261_vm7, %v1267_v47, 0.0 }
 0xb3f   :  { %1269 = vadd.xlane.f32.xlu2 %v1268_v53 }
 0xbb2   :  { %v1270_v58 = vpop.xlane.xlu2 %1269 }
 0xbb3   :  { %v1271_v61 = vmul.f32 %v1270_v58, %v1966_v42  ;;  %v1288_v42 = vperm.slane %v2064_v44, 5 }
 0xbb5   :  { %v1272_v62 = vadd.f32 1e-05, %v1271_v61 }
 0xbb7   :  { %1533 = vrsqrt.f32 %v1272_v62  ;;  %vm1279_vm9 = vweird.f32 %v1272_v62 }
 0xbbd   :  { %v1534_v48 = vpop.eup %1533 }
 0xbbe   :  { %v1274_v30 = vmul.f32 %v1534_v48, %v1272_v62  ;;  %vm1280_vm8 = vweird.f32 %v1534_v48 }
 0xbbf   :  { %vm1281_vm10 = vmor %vm1279_vm9, %vm1280_vm8 }
 0xbc0   :  { %v1275_v63 = vmul.f32 %v1534_v48, %v1274_v30 }
 0xbc2   :  { %v1276_v23 = vmul.f32 0.5, %v1275_v63 }
 0xbc4   :  { %v1277_v0 = vsub.f32 1.5, %v1276_v23 }
 0xbc6   :  { %v1278_v2 = vmul.f32 %v1534_v48, %v1277_v0 }
 0xbc8   :  { %v1282_v3 = vsel %vm1281_vm10, %v1534_v48, %v1278_v2 }
 0xbc9   :  { %v1283_v8 = vmul.f32 %v1282_v3, %v1266_v40 }
 0xbcb   :  { %v1285_v11 = vmul.f32 %v1284_v54, %v1283_v8 }
 0xbcd   :  { %v1287_v43 = vadd.f32 %v1286_v10, %v1285_v11 }
 0xbcf   :  { %1412 = vmatmul.msk.f32.vlgmr.msrb.gmra.mxu1 %vm94_vm0, %v1287_v43 }
 0xc4c   :  { %v1309_v27 = vpop.f32.mrf.mxu1 }
 0xc4d   :  { %v1310_v60 = vadd.f32 %v1309_v27, %v1288_v42 }
 0xc4f   :  { %v1313_v51 = vsel %vm1312_vm11, %v1310_v60, -inf }
 0xc50   :  { %1314 = vmax.xlane.f32.xlu0 %v1313_v51 }
 0xcc3   :  { %v1315_v55 = vpop.xlane.xlu0 %1314 }
 0xcc4   :  { %v1316_v13 = vsub.f32 %v1310_v60, %v1315_v55 }
 0xcc6   :  { %v1317_v16 = vmul.f32 1.442695, %v1316_v13 }
 0xcc8   :  { %1535 = vpow2.f32 %v1317_v16 }
 0xcce   :  { %v1536_v28 = vpop.eup %1535 }
 0xccf   :  { %v1319_v22 = vsel %vm1312_vm11, %v1536_v28, 0.0 }
 0xcd0   :  { %1320 = vadd.xlane.f32.xlu1 %v1319_v22 }
 0xd43   :  { %v1321_v29 = vpop.xlane.xlu1 %1320 }
 0xd44   :  { %1537 = vlog2.f32 %v1321_v29 }
 0xd4a   :  { %v1538_v24 = vpop.eup %1537 }
 0xd4b   :  { %v1323_v44 = vmul.f32 0.6931472, %v1538_v24 }
 0xd4d   :  { %v1324_v57 = vsub.f32 %v1316_v13, %v1323_v44 }
 0xd4f   :  { %1325 = vst [vmem:[#allocation5] sm:$0x3] %v1324_v57 }
 0xd50   :  { %1336 = dma.vmem_to_hbm [thread:$0]  %s1332_s29, 32, %s1334_s5, [#allocation4]  }
 0xd51   :  { %1590 = dma.done.wait [#allocation4], 32  }
 0xd52   :  { %1591 = vsyncadd [#allocation4], 4294967264 }
 0xd53   :  { %1341 = vsyncpa [#allocation3], 1 }
 0xd54   :  { %1342 = vsyncpa [#allocation4], 1 }

</bundles_post_ra>
